<compile_context>
chip_gen: v5e
topology: v5e:2x2
jax: 0.10.0
libtpu: 0.0.40
codegen_flags: <defaults>
</compile_context>

<pallas_src>
import jax
import jax.numpy as jnp
from jax.experimental import pallas as pl
from jax.experimental.pallas import tpu as pltpu

LANE = 128  # TPU lane width; tiny heads are padded to this many output columns


def _round_up(x, m):
    return (x + m - 1) // m * m


def _mlp_kernel(x_ref, w1_ref, b1_ref, we_ref, be_ref,
                w2a_ref, w2b_ref, b2_ref, w3_ref, b3_ref,
                w4_ref, b4_ref, out_ref, env_ref):
    bf16 = jnp.bfloat16
    x = x_ref[...]                                                   # (TB, n) bf16

    # envelope_extraction_layers: Linear(n, n/4) + ReLU   (Dropouts = identity)
    h = jnp.dot(x, w1_ref[...], preferred_element_type=jnp.float32) + b1_ref[...]
    h = jnp.maximum(h, 0.0)                                          # (TB, n/4) f32
    h_bf = h.astype(bf16)

    # envelope_layer: Linear(n/4, 1) + ReLU, head zero-padded to 128 lanes
    # (columns 1.. are exactly 0 because the padded weights/bias are 0).
    env = jnp.dot(h_bf, we_ref[...], preferred_element_type=jnp.float32) + be_ref[...]
    env = jnp.maximum(env, 0.0)                                      # (TB, 128) f32

    # higher_processing_layers
    # concat([h, env]) @ W2  ==  h @ W2[:n/4]  +  env @ W2[n/4:]   (exact folding)
    h2 = (jnp.dot(h_bf, w2a_ref[...], preferred_element_type=jnp.float32)
          + jnp.dot(env.astype(bf16), w2b_ref[...], preferred_element_type=jnp.float32)
          + b2_ref[...])
    h2 = jnp.maximum(h2, 0.0)                                        # (TB, n/16) f32

    h3 = jnp.dot(h2.astype(bf16), w3_ref[...], preferred_element_type=jnp.float32) + b3_ref[...]
    h3 = jnp.maximum(h3, 0.0)                                        # (TB, n/64) f32

    logits = (jnp.dot(h3.astype(bf16), w4_ref[...], preferred_element_type=jnp.float32)
              + b4_ref[...])                                         # (TB, 128) f32
    out_ref[...] = jax.nn.sigmoid(logits)   # lane-dense store; col 0 = real output
    env_ref[...] = env                      # lane-dense store; col 0 = real envelope


def envelope_mlp_forward(x, kparams, *, tb=128):
    """x: (B, n_features) float32. Returns (output (B,1) f32, envelope (B,1) f32)."""
    B, n = x.shape
    tb = min(tb, _round_up(B, 8))          # never use a tile bigger than the (padded) batch
    Bp = _round_up(B, tb)
    num_tiles = Bp // tb

    xp = jnp.pad(x.astype(jnp.bfloat16), ((0, Bp - B), (0, 0)))

    weights = (kparams["w1"], kparams["b1"],
               kparams["we"], kparams["be"],
               kparams["w2a"], kparams["w2b"], kparams["b2"],
               kparams["w3"], kparams["b3"],
               kparams["w4"], kparams["b4"])

    def const_spec(a):
        # Whole (grid-invariant) array resident in VMEM; same block every grid step.
        # Bind ndim explicitly (no late-binding of the loop variable).
        return pl.BlockSpec(a.shape, lambda i, _nd=a.ndim: (0,) * _nd)

    in_specs = [pl.BlockSpec((tb, n), lambda i: (i, 0))] + [const_spec(a) for a in weights]
    out_specs = (pl.BlockSpec((tb, LANE), lambda i: (i, 0)),
                 pl.BlockSpec((tb, LANE), lambda i: (i, 0)))
    out_shape = (jax.ShapeDtypeStruct((Bp, LANE), jnp.float32),
                 jax.ShapeDtypeStruct((Bp, LANE), jnp.float32))

    n4 = kparams["w1"].shape[1]
    n16 = kparams["w2a"].shape[1]
    n64 = kparams["w3"].shape[1]
    flops = 2 * Bp * (n * n4 + n4 * LANE + n4 * n16 + LANE * n16 + n16 * n64 + n64 * LANE)
    bytes_accessed = (int(xp.size) * 2
                      + sum(int(a.size) * a.dtype.itemsize for a in weights)
                      + 2 * Bp * LANE * 4)
    cost = pl.CostEstimate(flops=int(flops),
                           transcendentals=int(Bp * LANE),
                           bytes_accessed=int(bytes_accessed))

    out_pad, env_pad = pl.pallas_call(
        _mlp_kernel,
        out_shape=out_shape,
        grid=(num_tiles,),
        in_specs=in_specs,
        out_specs=out_specs,
        compiler_params=pltpu.CompilerParams(
            dimension_semantics=("parallel",),          # shard batch tiles across TCs (v7x)
            vmem_limit_bytes=48 * 1024 * 1024),         # explicit budget (safe on v5e/v6e/v7x)
        cost_estimate=cost,
    )(xp, *weights)

    return out_pad[:B, :1], env_pad[:B, :1]


def init_params(key, n_features):
    """f32 params matching the PyTorch module (weights stored as (in, out))."""
    n4, n16, n64 = n_features // 4, n_features // 16, n_features // 64
    ks = jax.random.split(key, 10)

    def lin(kw, kb, fan_in, fan_out):
        bound = 1.0 / (fan_in ** 0.5)     # nn.Linear default init
        w = jax.random.uniform(kw, (fan_in, fan_out), jnp.float32, -bound, bound)
        b = jax.random.uniform(kb, (1, fan_out), jnp.float32, -bound, bound)
        return w, b

    w1, b1 = lin(ks[0], ks[1], n_features, n4)
    we, be = lin(ks[2], ks[3], n4, 1)
    w2, b2 = lin(ks[4], ks[5], n4 + 1, n16)
    w3, b3 = lin(ks[6], ks[7], n16, n64)
    w4, b4 = lin(ks[8], ks[9], n64, 1)
    return {"w1": w1, "b1": b1, "we": we, "be": be, "w2": w2, "b2": b2,
            "w3": w3, "b3": b3, "w4": w4, "b4": b4}


def prepare_kernel_params(params):
    """Kernel-ready params: bf16 weights, f32 biases, 1-wide heads zero-padded to 128 lanes."""
    bf = jnp.bfloat16
    n4 = params["w1"].shape[1]

    def pad_cols(a, width=LANE):
        return jnp.pad(a, ((0, 0), (0, width - a.shape[1])))

    return {
        "w1": params["w1"].astype(bf),
        "b1": params["b1"],
        # envelope head: 1 -> 128 output columns (zeros in the padded columns)
        "we": pad_cols(params["we"]).astype(bf),
        "be": pad_cols(params["be"]),
        # split W2: rows multiplying h and the (padded-to-128-rows) row multiplying env
        "w2a": params["w2"][:n4, :].astype(bf),
        "w2b": jnp.pad(params["w2"][n4:, :], ((0, LANE - 1), (0, 0))).astype(bf),
        "b2": params["b2"],
        "w3": params["w3"].astype(bf),
        "b3": params["b3"],
        # sigmoid head: 1 -> 128 output columns
        "w4": pad_cols(params["w4"]).astype(bf),
        "b4": pad_cols(params["b4"]),
    }


def reference_forward_f32(x, params):
    """Pure-f32 JAX reference mirroring the PyTorch module exactly (real concat)."""
    h = jnp.maximum(x @ params["w1"] + params["b1"], 0.0)
    env = jnp.maximum(h @ params["we"] + params["be"], 0.0)
    cat = jnp.concatenate([h, env], axis=1)
    h2 = jnp.maximum(cat @ params["w2"] + params["b2"], 0.0)
    h3 = jnp.maximum(h2 @ params["w3"] + params["b3"], 0.0)
    out = jax.nn.sigmoid(h3 @ params["w4"] + params["b4"])
    return out, env


def reference_forward_bf16(x, params):
    """Reference using the same bf16-inputs / f32-accumulate scheme as the kernel."""
    bf = jnp.bfloat16

    def mm(a, w):
        return jnp.dot(a.astype(bf), w.astype(bf), preferred_element_type=jnp.float32)

    h = jnp.maximum(mm(x, params["w1"]) + params["b1"], 0.0)
    env = jnp.maximum(mm(h, params["we"]) + params["be"], 0.0)
    cat = jnp.concatenate([h, env], axis=1)
    h2 = jnp.maximum(mm(cat, params["w2"]) + params["b2"], 0.0)
    h3 = jnp.maximum(mm(h2, params["w3"]) + params["b3"], 0.0)
    out = jax.nn.sigmoid(mm(h3, params["w4"]) + params["b4"])
    return out, env


if __name__ == "__main__":
    key = jax.random.PRNGKey(0)
    k_x, k_p = jax.random.split(key)

    n_features = 256      # -> hidden sizes 64, 16, 4
    batch = 200           # not a multiple of the 128-row tile: exercises pad + slice path

    x = jax.random.normal(k_x, (batch, n_features), jnp.float32)
    params = init_params(k_p, n_features)
    kparams = prepare_kernel_params(params)

    out, env = jax.block_until_ready(envelope_mlp_forward(x, kparams, tb=128))
    assert out.shape == (batch, 1) and env.shape == (batch, 1)

    # Tight check against a reference using the identical bf16/f32 numerics.
    ref_out_bf, ref_env_bf = reference_forward_bf16(x, params)
    assert jnp.allclose(out, ref_out_bf, atol=1e-3, rtol=1e-3), \
        float(jnp.max(jnp.abs(out - ref_out_bf)))
    assert jnp.allclose(env, ref_env_bf, atol=1e-3, rtol=1e-3), \
        float(jnp.max(jnp.abs(env - ref_env_bf)))

    # Sanity check against the full-f32 PyTorch-equivalent reference (bf16 tolerance).
    ref_out, ref_env = reference_forward_f32(x, params)
    assert jnp.allclose(out, ref_out, atol=5e-2, rtol=5e-2)
    assert jnp.allclose(env, ref_env, atol=5e-2, rtol=5e-2)

    print("KERNEL_OK")
</pallas_src>

<mosaic_0001>
module attributes {stable_mosaic.version = 11 : i64} {
  func.func @_mlp_kernel(%arg0: i32, %arg1: memref<128x256xbf16, #tpu.memory_space<vmem>>, %arg2: memref<256x64xbf16, #tpu.memory_space<vmem>>, %arg3: memref<1x64xf32, #tpu.memory_space<vmem>>, %arg4: memref<64x128xbf16, #tpu.memory_space<vmem>>, %arg5: memref<1x128xf32, #tpu.memory_space<vmem>>, %arg6: memref<64x16xbf16, #tpu.memory_space<vmem>>, %arg7: memref<128x16xbf16, #tpu.memory_space<vmem>>, %arg8: memref<1x16xf32, #tpu.memory_space<vmem>>, %arg9: memref<16x4xbf16, #tpu.memory_space<vmem>>, %arg10: memref<1x4xf32, #tpu.memory_space<vmem>>, %arg11: memref<4x128xbf16, #tpu.memory_space<vmem>>, %arg12: memref<1x128xf32, #tpu.memory_space<vmem>>, %arg13: memref<128x128xf32, #tpu.memory_space<vmem>>, %arg14: memref<128x128xf32, #tpu.memory_space<vmem>>) attributes {dimension_semantics = [#tpu.dimension_semantics<parallel>], iteration_bounds = array<i64: 2>, scalar_prefetch = 0 : i64, scratch_operands = 0 : i64, tpu.core_type = #tpu.core_type<tc>, window_params = [{transform_indices = @transform_0, window_bounds = array<i64: 128, 256>}, {pipeline_mode = #tpu.pipeline_mode<synchronous>, transform_indices = @transform_1, window_bounds = array<i64: 256, 64>}, {pipeline_mode = #tpu.pipeline_mode<synchronous>, transform_indices = @transform_2, window_bounds = array<i64: 1, 64>}, {pipeline_mode = #tpu.pipeline_mode<synchronous>, transform_indices = @transform_3, window_bounds = array<i64: 64, 128>}, {pipeline_mode = #tpu.pipeline_mode<synchronous>, transform_indices = @transform_4, window_bounds = array<i64: 1, 128>}, {pipeline_mode = #tpu.pipeline_mode<synchronous>, transform_indices = @transform_5, window_bounds = array<i64: 64, 16>}, {pipeline_mode = #tpu.pipeline_mode<synchronous>, transform_indices = @transform_6, window_bounds = array<i64: 128, 16>}, {pipeline_mode = #tpu.pipeline_mode<synchronous>, transform_indices = @transform_7, window_bounds = array<i64: 1, 16>}, {pipeline_mode = #tpu.pipeline_mode<synchronous>, transform_indices = @transform_8, window_bounds = array<i64: 16, 4>}, {pipeline_mode = #tpu.pipeline_mode<synchronous>, transform_indices = @transform_9, window_bounds = array<i64: 1, 4>}, {pipeline_mode = #tpu.pipeline_mode<synchronous>, transform_indices = @transform_10, window_bounds = array<i64: 4, 128>}, {pipeline_mode = #tpu.pipeline_mode<synchronous>, transform_indices = @transform_11, window_bounds = array<i64: 1, 128>}, {transform_indices = @transform_12, window_bounds = array<i64: 128, 128>}, {transform_indices = @transform_13, window_bounds = array<i64: 128, 128>}]} {
    %c0 = arith.constant 0 : index
    %c0_0 = arith.constant 0 : index
    %0 = vector.load %arg1[%c0, %c0_0] : memref<128x256xbf16, #tpu.memory_space<vmem>>, vector<128x256xbf16>
    %c0_1 = arith.constant 0 : index
    %c0_2 = arith.constant 0 : index
    %1 = vector.load %arg2[%c0_1, %c0_2] : memref<256x64xbf16, #tpu.memory_space<vmem>>, vector<256x64xbf16>
    %cst = arith.constant dense<0.000000e+00> : vector<128x64xf32>
    %2 = tpu.matmul %0, %1, %cst {dimension_numbers = #tpu.dot_dimension_numbers<[1], [0], [0], [1], [0, 0, 1, 1], [], []>} : vector<128x256xbf16>, vector<256x64xbf16>, vector<128x64xf32> -> vector<128x64xf32>
    %c0_3 = arith.constant 0 : index
    %c0_4 = arith.constant 0 : index
    %3 = vector.load %arg3[%c0_3, %c0_4] : memref<1x64xf32, #tpu.memory_space<vmem>>, vector<1x64xf32>
    %4 = vector.broadcast %3 : vector<1x64xf32> to vector<128x64xf32>
    %5 = arith.addf %2, %4 : vector<128x64xf32>
    %cst_5 = arith.constant 0.000000e+00 : f32
    %6 = vector.broadcast %cst_5 : f32 to vector<128x64xf32>
    %7 = arith.maximumf %5, %6 : vector<128x64xf32>
    %8 = arith.truncf %7 : vector<128x64xf32> to vector<128x64xbf16>
    %c0_6 = arith.constant 0 : index
    %c0_7 = arith.constant 0 : index
    %9 = vector.load %arg4[%c0_6, %c0_7] : memref<64x128xbf16, #tpu.memory_space<vmem>>, vector<64x128xbf16>
    %cst_8 = arith.constant dense<0.000000e+00> : vector<128x128xf32>
    %10 = tpu.matmul %8, %9, %cst_8 {dimension_numbers = #tpu.dot_dimension_numbers<[1], [0], [0], [1], [0, 0, 1, 1], [], []>} : vector<128x64xbf16>, vector<64x128xbf16>, vector<128x128xf32> -> vector<128x128xf32>
    %c0_9 = arith.constant 0 : index
    %c0_10 = arith.constant 0 : index
    %11 = vector.load %arg5[%c0_9, %c0_10] : memref<1x128xf32, #tpu.memory_space<vmem>>, vector<1x128xf32>
    %12 = vector.broadcast %11 : vector<1x128xf32> to vector<128x128xf32>
    %13 = arith.addf %10, %12 : vector<128x128xf32>
    %cst_11 = arith.constant 0.000000e+00 : f32
    %14 = vector.broadcast %cst_11 : f32 to vector<128x128xf32>
    %15 = arith.maximumf %13, %14 : vector<128x128xf32>
    %c0_12 = arith.constant 0 : index
    %c0_13 = arith.constant 0 : index
    %16 = vector.load %arg6[%c0_12, %c0_13] : memref<64x16xbf16, #tpu.memory_space<vmem>>, vector<64x16xbf16>
    %cst_14 = arith.constant dense<0.000000e+00> : vector<128x16xf32>
    %17 = tpu.matmul %8, %16, %cst_14 {dimension_numbers = #tpu.dot_dimension_numbers<[1], [0], [0], [1], [0, 0, 1, 1], [], []>} : vector<128x64xbf16>, vector<64x16xbf16>, vector<128x16xf32> -> vector<128x16xf32>
    %18 = arith.truncf %15 : vector<128x128xf32> to vector<128x128xbf16>
    %c0_15 = arith.constant 0 : index
    %c0_16 = arith.constant 0 : index
    %19 = vector.load %arg7[%c0_15, %c0_16] : memref<128x16xbf16, #tpu.memory_space<vmem>>, vector<128x16xbf16>
    %cst_17 = arith.constant dense<0.000000e+00> : vector<128x16xf32>
    %20 = tpu.matmul %18, %19, %cst_17 {dimension_numbers = #tpu.dot_dimension_numbers<[1], [0], [0], [1], [0, 0, 1, 1], [], []>} : vector<128x128xbf16>, vector<128x16xbf16>, vector<128x16xf32> -> vector<128x16xf32>
    %21 = arith.addf %17, %20 : vector<128x16xf32>
    %c0_18 = arith.constant 0 : index
    %c0_19 = arith.constant 0 : index
    %22 = vector.load %arg8[%c0_18, %c0_19] : memref<1x16xf32, #tpu.memory_space<vmem>>, vector<1x16xf32>
    %23 = vector.broadcast %22 : vector<1x16xf32> to vector<128x16xf32>
    %24 = arith.addf %21, %23 : vector<128x16xf32>
    %cst_20 = arith.constant 0.000000e+00 : f32
    %25 = vector.broadcast %cst_20 : f32 to vector<128x16xf32>
    %26 = arith.maximumf %24, %25 : vector<128x16xf32>
    %27 = arith.truncf %26 : vector<128x16xf32> to vector<128x16xbf16>
    %c0_21 = arith.constant 0 : index
    %c0_22 = arith.constant 0 : index
    %28 = vector.load %arg9[%c0_21, %c0_22] : memref<16x4xbf16, #tpu.memory_space<vmem>>, vector<16x4xbf16>
    %cst_23 = arith.constant dense<0.000000e+00> : vector<128x4xf32>
    %29 = tpu.matmul %27, %28, %cst_23 {dimension_numbers = #tpu.dot_dimension_numbers<[1], [0], [0], [1], [0, 0, 1, 1], [], []>} : vector<128x16xbf16>, vector<16x4xbf16>, vector<128x4xf32> -> vector<128x4xf32>
    %c0_24 = arith.constant 0 : index
    %c0_25 = arith.constant 0 : index
    %30 = vector.load %arg10[%c0_24, %c0_25] : memref<1x4xf32, #tpu.memory_space<vmem>>, vector<1x4xf32>
    %31 = vector.broadcast %30 : vector<1x4xf32> to vector<128x4xf32>
    %32 = arith.addf %29, %31 : vector<128x4xf32>
    %cst_26 = arith.constant 0.000000e+00 : f32
    %33 = vector.broadcast %cst_26 : f32 to vector<128x4xf32>
    %34 = arith.maximumf %32, %33 : vector<128x4xf32>
    %35 = arith.truncf %34 : vector<128x4xf32> to vector<128x4xbf16>
    %c0_27 = arith.constant 0 : index
    %c0_28 = arith.constant 0 : index
    %36 = vector.load %arg11[%c0_27, %c0_28] : memref<4x128xbf16, #tpu.memory_space<vmem>>, vector<4x128xbf16>
    %cst_29 = arith.constant dense<0.000000e+00> : vector<128x128xf32>
    %37 = tpu.matmul %35, %36, %cst_29 {dimension_numbers = #tpu.dot_dimension_numbers<[1], [0], [0], [1], [0, 0, 1, 1], [], []>} : vector<128x4xbf16>, vector<4x128xbf16>, vector<128x128xf32> -> vector<128x128xf32>
    %c0_30 = arith.constant 0 : index
    %c0_31 = arith.constant 0 : index
    %38 = vector.load %arg12[%c0_30, %c0_31] : memref<1x128xf32, #tpu.memory_space<vmem>>, vector<1x128xf32>
    %39 = vector.broadcast %38 : vector<1x128xf32> to vector<128x128xf32>
    %40 = arith.addf %37, %39 : vector<128x128xf32>
    %41 = arith.negf %40 : vector<128x128xf32>
    %42 = math.exp %41 : vector<128x128xf32>
    %cst_32 = arith.constant 1.000000e+00 : f32
    %43 = vector.broadcast %cst_32 : f32 to vector<128x128xf32>
    %44 = arith.addf %43, %42 : vector<128x128xf32>
    %45 = arith.divf %43, %44 : vector<128x128xf32>
    %c0_33 = arith.constant 0 : index
    %c0_34 = arith.constant 0 : index
    %46 = vector.load %arg13[%c0_33, %c0_34] : memref<128x128xf32, #tpu.memory_space<vmem>>, vector<128x128xf32>
    tpu.vector_store %arg13[%c0_33, %c0_34], %45 {strides = array<i32>} : memref<128x128xf32, #tpu.memory_space<vmem>>, vector<128x128xf32>,
    %c0_35 = arith.constant 0 : index
    %c0_36 = arith.constant 0 : index
    %47 = vector.load %arg14[%c0_35, %c0_36] : memref<128x128xf32, #tpu.memory_space<vmem>>, vector<128x128xf32>
    tpu.vector_store %arg14[%c0_35, %c0_36], %15 {strides = array<i32>} : memref<128x128xf32, #tpu.memory_space<vmem>>, vector<128x128xf32>,
    return
  }
  func.func @transform_0(%arg0: i32) -> (i32, i32) {
    %c0_i32 = arith.constant 0 : i32
    %c0_i32_0 = arith.constant 0 : i32
    return %arg0, %c0_i32 : i32, i32
  }
  func.func @transform_1(%arg0: i32) -> (i32, i32) {
    %c0_i32 = arith.constant 0 : i32
    %c0_i32_0 = arith.constant 0 : i32
    %c0_i32_1 = arith.constant 0 : i32
    return %c0_i32, %c0_i32_0 : i32, i32
  }
  func.func @transform_2(%arg0: i32) -> (i32, i32) {
    %c0_i32 = arith.constant 0 : i32
    %c0_i32_0 = arith.constant 0 : i32
    %c0_i32_1 = arith.constant 0 : i32
    return %c0_i32, %c0_i32_0 : i32, i32
  }
  func.func @transform_3(%arg0: i32) -> (i32, i32) {
    %c0_i32 = arith.constant 0 : i32
    %c0_i32_0 = arith.constant 0 : i32
    %c0_i32_1 = arith.constant 0 : i32
    return %c0_i32, %c0_i32_0 : i32, i32
  }
  func.func @transform_4(%arg0: i32) -> (i32, i32) {
    %c0_i32 = arith.constant 0 : i32
    %c0_i32_0 = arith.constant 0 : i32
    %c0_i32_1 = arith.constant 0 : i32
    return %c0_i32, %c0_i32_0 : i32, i32
  }
  func.func @transform_5(%arg0: i32) -> (i32, i32) {
    %c0_i32 = arith.constant 0 : i32
    %c0_i32_0 = arith.constant 0 : i32
    %c0_i32_1 = arith.constant 0 : i32
    return %c0_i32, %c0_i32_0 : i32, i32
  }
  func.func @transform_6(%arg0: i32) -> (i32, i32) {
    %c0_i32 = arith.constant 0 : i32
    %c0_i32_0 = arith.constant 0 : i32
    %c0_i32_1 = arith.constant 0 : i32
    return %c0_i32, %c0_i32_0 : i32, i32
  }
  func.func @transform_7(%arg0: i32) -> (i32, i32) {
    %c0_i32 = arith.constant 0 : i32
    %c0_i32_0 = arith.constant 0 : i32
    %c0_i32_1 = arith.constant 0 : i32
    return %c0_i32, %c0_i32_0 : i32, i32
  }
  func.func @transform_8(%arg0: i32) -> (i32, i32) {
    %c0_i32 = arith.constant 0 : i32
    %c0_i32_0 = arith.constant 0 : i32
    %c0_i32_1 = arith.constant 0 : i32
    return %c0_i32, %c0_i32_0 : i32, i32
  }
  func.func @transform_9(%arg0: i32) -> (i32, i32) {
    %c0_i32 = arith.constant 0 : i32
    %c0_i32_0 = arith.constant 0 : i32
    %c0_i32_1 = arith.constant 0 : i32
    return %c0_i32, %c0_i32_0 : i32, i32
  }
  func.func @transform_10(%arg0: i32) -> (i32, i32) {
    %c0_i32 = arith.constant 0 : i32
    %c0_i32_0 = arith.constant 0 : i32
    %c0_i32_1 = arith.constant 0 : i32
    return %c0_i32, %c0_i32_0 : i32, i32
  }
  func.func @transform_11(%arg0: i32) -> (i32, i32) {
    %c0_i32 = arith.constant 0 : i32
    %c0_i32_0 = arith.constant 0 : i32
    %c0_i32_1 = arith.constant 0 : i32
    return %c0_i32, %c0_i32_0 : i32, i32
  }
  func.func @transform_12(%arg0: i32) -> (i32, i32) {
    %c0_i32 = arith.constant 0 : i32
    %c0_i32_0 = arith.constant 0 : i32
    return %arg0, %c0_i32 : i32, i32
  }
  func.func @transform_13(%arg0: i32) -> (i32, i32) {
    %c0_i32 = arith.constant 0 : i32
    %c0_i32_0 = arith.constant 0 : i32
    return %arg0, %c0_i32 : i32, i32
  }
}

</mosaic_0001>

<bundles_post_ra>
// kernel: tpu_custom_call.1
= control target key start
LH: loop header
LB: loop body
LE: loop exit
PB: predicated region body
PF: predicated region fallthrough
CT: control target
= control target key end

     0   :  { %s2934_s0 = inlined_call_operand.vmem [shape: bf16[256,256], index: 0, kind: input, shape index: {}]   ;;  %s2935_s1 = inlined_call_operand.vmem [shape: bf16[256,64], index: 1, kind: input, shape index: {}]   ;;  %s2936_s2 = inlined_call_operand.vmem [shape: f32[1,64], index: 2, kind: input, shape index: {}]   ;;  %s2937_s3 = inlined_call_operand.vmem [shape: bf16[64,128], index: 3, kind: input, shape index: {}]   ;;  %s2938_s4 = inlined_call_operand.vmem [shape: f32[1,128], index: 4, kind: input, shape index: {}]   ;;  %s2939_s5 = inlined_call_operand.vmem [shape: bf16[64,16], index: 5, kind: input, shape index: {}]   ;;  %s2940_s6 = inlined_call_operand.vmem [shape: bf16[128,16], index: 6, kind: input, shape index: {}]   ;;  %s2941_s7 = inlined_call_operand.vmem [shape: f32[1,16], index: 7, kind: input, shape index: {}]   ;;  %s2942_s8 = inlined_call_operand.vmem [shape: bf16[16,4], index: 8, kind: input, shape index: {}]   ;;  %s2943_s9 = inlined_call_operand.vmem [shape: f32[1,4], index: 9, kind: input, shape index: {}]   ;;  %s2944_s10 = inlined_call_operand.vmem [shape: bf16[4,128], index: 10, kind: input, shape index: {}]   ;;  %s2945_s11 = inlined_call_operand.vmem [shape: f32[1,128], index: 11, kind: input, shape index: {}]   ;;  %s2946_s12 = inlined_call_operand.hbm [shape: f32[256,128], index: 12, kind: output, shape index: {0}]   ;;  %s2947_s13 = inlined_call_operand.hbm [shape: f32[256,128], index: 13, kind: output, shape index: {1}]  }
   0x1   :  { %2953 = sst [smem:[#allocation12_spill]] %s2934_s0 }
   0x2   :  { %2954 = sst [smem:[#allocation13_spill]] %s2935_s1 }
   0x3   :  { %19 = vsyncpa [#allocation3], 0 }
   0x4   :  { %21 = vsyncpa [#allocation3 + $0x1], 0 }
   0x5   :  { %22 = vsyncpa [#allocation5], 0 }
   0x6   :  { %24 = vsyncpa [#allocation5 + $0x1], 0  ;;  %s2458_s25 = smov 0   ;;  %s2460_s26 = smov 0  }
   0x7   :  { %s2462_s27 = smov 0   ;;  %s2464_s28 = smov 0  }
   0x8 LB: > { %2955 = sst [smem:[#allocation8_spill]] %s2380_s27  ;;  %s2479_s29 = sadd.s32 4294967295, %s2384_s28   ;;  %s2384_s28 = sphi %s2464_s28, %s2967_s28   ;;  %s2380_s27 = sphi %s2462_s27, %s2969_s27   ;;  %s2376_s26 = sphi %s2460_s26, %s2971_s26   ;;  %s2372_s25 = sphi %s2458_s25, %s2970_s25  }
   0x9   : > { %s1842_s30 = sadd.s32 4294967294, %s2384_s28   ;;  %s2483_s14 = sadd.s32 1, %s2384_s28  }
   0xa   : > { %2956 = sst [smem:[#allocation9_spill]] %s2483_s14  ;;  %s294_s15 = sadd.s32 1, %s2380_s27 }
   0xb   : > { %s291_s16 = ssub.s32 %s2384_s28, %s2483_s14  ;;  %p304_p0 = scmp.ne.s32.totalorder %s2380_s27, %s2376_s26 }
   0xc   : > { %p292_p1 = scmp.eq.s32.totalorder %s291_s16, 0  ;;  %p305_p2 = scmp.eq.s32.totalorder %s2479_s29, 1 }
   0xd   : > { %p310_p3 = scmp.ne.s32.totalorder %s2376_s26, %s2372_s25  ;;  %p311_p4 = scmp.eq.s32.totalorder %s1842_s30, 1 }
   0xe   : > { %s2494_s17 = scalar_select %p292_p1, %s2380_s27, %s294_s15  }
   0xf   : > { %p2496_p5 = por %p305_p2, %p304_p0  ;;  %p2500_p6 = por %p311_p4, %p310_p3 }
  0x10   : > { %2957 = sst [smem:[#allocation10_spill]] %s2494_s17  ;;  %p1845_p7 = scmp.ge.s32.totalorder %s2384_s28, 1 }
  0x11   : > { %s2959_s19 = scalar_select %p2500_p6, 1, 0 }
  0x12   : > { %p398_p8 = scmp.lt.s32.totalorder %s2384_s28, 3 }
  0x13   : > { %2960 = sst [smem:[#allocation11_spill]] %s2959_s19 }
  0x14   : > { %p399_p9 = pnand %p1845_p7, %p398_p8 }
  0x15   : > { %s2961_s1 = sld [smem:[#allocation13_spill]] (!%p399_p9)  ;;  %s1848_s22 = sshll.u32 (!%p399_p9), %s2479_s29, 4 }
  0x16   : > { %402 = sbr.rel (%p399_p9) target bundleno = 930 (0x3a2), region = 68  ;;  %p449_p10 = scmp.lt.s32.totalorder (!%p399_p9), %s1848_s22, 31 }
  0x17   : > { %s2962_s0 = sld [smem:[#allocation12_spill]] (!%p399_p9)  ;;  %s2702_s24 = sand.u32 (!%p399_p9), 1, %s2376_s26  }
  0x18   : > { %s1846_s19 = sshll.u32 (!%p399_p9), %s2702_s24, 7  ;;  %s1715_s30 = scalar_lea.sflag (!%p399_p9), [#allocation5], %s2702_s24 }
  0x19   : > { %s2822_s17 = scalar_lea.vmem (!%p399_p9), [#allocation2], %s1846_s19  ;;  %s2310_s20 = scalar_lea.hbm (!%p399_p9), %s2947_s13, 256 }
  0x1b   : > { %v2127_v0 = vld [vmem:[%s2961_s1 + $0x38] sm:$0xff]  ;;  %v2126_v2 = vld [vmem:[%s2961_s1 + $0x30] sm:$0xff]  ;;  %v2125_v4 = vld [vmem:[%s2961_s1 + $0x28] sm:$0xff]  ;;  %s2973_s22 = smov (!%p449_p10, %s1848_s22), 31  ;;  %vm844_vm0 = vcmask 523264   ;;  %vm1192_vm1 = vcmask 130048  }
  0x1c   : > { %v2135_v1 = vld [vmem:[%s2961_s1 + $0x78] sm:$0xff]  ;;  %686 = vmatpush.bf16.msra.mxu0 %v2127_v0  ;;  %v2134_v3 = vld [vmem:[%s2961_s1 + $0x70] sm:$0xff]  ;;  %2155 = vmatpush.bf16.msra.mxu3 %v2127_v0  ;;  %v2133_v5 = vld [vmem:[%s2961_s1 + $0x68] sm:$0xff]  ;;  %s2103_s15 = sshll.u32 %s2973_s22, 3  ;;  %vm1320_vm2 = vcmask 1041408   ;;  %vm1295_vm3 = vcmask 31744  }
  0x1d   : > { %735 = vmatpush.bf16.msra.mxu1 %v2135_v1  ;;  %v2124_v6 = vld [vmem:[%s2961_s1 + $0x20] sm:$0xff]  ;;  %v2123_v8 = vld [vmem:[%s2961_s1 + $0x18] sm:$0xff]  ;;  %v2122_v10 = vld [vmem:[%s2961_s1 + $0x10] sm:$0xff]  ;;  %s2552_s21 = scalar_lea.vmem %s2962_s0, %s2103_s15  ;;  %s2715_s15 = scalar_lea.vmem [#allocation4], %s1846_s19 }
  0x1e   : > { %v2132_v7 = vld [vmem:[%s2961_s1 + $0x60] sm:$0xff]  ;;  %v2131_v9 = vld [vmem:[%s2961_s1 + $0x58] sm:$0xff]  ;;  %v2130_v11 = vld [vmem:[%s2961_s1 + $0x50] sm:$0xff]  ;;  %s2952_s19 = sshll.u32 %s2479_s29, 7  ;;  %s1744_s22 = sshll.u32 %s2715_s15, 4  ;;  %s1745_s22 = int_to_ptr.vmem [resolvable:$true] %s1744_s22 }
  0x1f   : > { %v2121_v12 = vld [vmem:[%s2961_s1 + $0x8] sm:$0xff]  ;;  %v2120_v14 = vld [vmem:[%s2961_s1] sm:$0xff]  ;;  %v1861_v25 = vld [vmem:[%s2552_s21 + $0x10] sm:$0xf] }
  0x20   : > { %687 = vmatpush.bf16.msra.mxu0 %v2126_v2  ;;  %2156 = vmatpush.bf16.msra.mxu3 %v2126_v2  ;;  %v2129_v13 = vld [vmem:[%s2961_s1 + $0x48] sm:$0xff]  ;;  %v2128_v15 = vld [vmem:[%s2961_s1 + $0x40] sm:$0xff]  ;;  %v2107_v26 = vld [vmem:[%s2552_s21 + $0x14] sm:$0xf0] }
  0x21   : > { %736 = vmatpush.bf16.msra.mxu1 %v2134_v3  ;;  %v1853_v16 = vld [vmem:[%s2552_s21] sm:$0xf]  ;;  %v2105_v17 = vld [vmem:[%s2552_s21 + $0x4] sm:$0xf0]  ;;  %v2104_v18 = vld [vmem:[%s2552_s21 + $0x4] sm:$0xf]  ;;  %v1862_v31 = vor.u32 %v2107_v26, %v1861_v25 }
  0x22   : > { %v1855_v19 = vld [vmem:[%s2552_s21 + $0x8] sm:$0xf0]  ;;  %v1901_v20 = vld [vmem:[%s2552_s21 + $0x60] sm:$0xf]  ;;  %v2117_v21 = vld [vmem:[%s2552_s21 + $0x64] sm:$0xf0]  ;;  %v1854_v22 = vor.u32 %v2105_v17, %v1853_v16 }
  0x23   : > { %v1858_v23 = vor.u32 %v2104_v18, %v1855_v19  ;;  %v1902_v24 = vor.u32 %v2117_v21, %v1901_v20  ;;  %v2106_v27 = vld [vmem:[%s2552_s21 + $0x14] sm:$0xf]  ;;  %v1863_v28 = vld [vmem:[%s2552_s21 + $0x18] sm:$0xf0]  ;;  %v1909_v29 = vld [vmem:[%s2552_s21 + $0x70] sm:$0xf] }
  0x24   : > { %688 = vmatpush.bf16.msra.mxu0 %v2125_v4  ;;  %2157 = vmatpush.bf16.msra.mxu3 %v2125_v4  ;;  %v2119_v30 = vld [vmem:[%s2552_s21 + $0x74] sm:$0xf0]  ;;  %v1866_v32 = vor.u32 %v2106_v27, %v1863_v28  ;;  %v1869_v34 = vld [vmem:[%s2552_s21 + $0x20] sm:$0xf]  ;;  %v2109_v35 = vld [vmem:[%s2552_s21 + $0x24] sm:$0xf0] }
  0x25   : > { %737 = vmatpush.bf16.msra.mxu1 %v2133_v5  ;;  %v1910_v33 = vor.u32 %v2119_v30, %v1909_v29  ;;  %v2108_v36 = vld [vmem:[%s2552_s21 + $0x24] sm:$0xf]  ;;  %v1871_v37 = vld [vmem:[%s2552_s21 + $0x28] sm:$0xf0]  ;;  %v1870_v40 = vor.u32 %v2109_v35, %v1869_v34  ;;  %v1877_v43 = vld [vmem:[%s2552_s21 + $0x30] sm:$0xf] }
  0x26   : > { %v2116_v38 = vld [vmem:[%s2552_s21 + $0x64] sm:$0xf]  ;;  %v1903_v39 = vld [vmem:[%s2552_s21 + $0x68] sm:$0xf0]  ;;  %v1874_v41 = vor.u32 %v2108_v36, %v1871_v37  ;;  %v2111_v44 = vld [vmem:[%s2552_s21 + $0x34] sm:$0xf0] }
  0x27   : > { %v1906_v42 = vor.u32 %v2116_v38, %v1903_v39  ;;  %v2110_v45 = vld [vmem:[%s2552_s21 + $0x34] sm:$0xf]  ;;  %v1879_v46 = vld [vmem:[%s2552_s21 + $0x38] sm:$0xf0]  ;;  %v1878_v49 = vor.u32 %v2111_v44, %v1877_v43  ;;  %v1885_v52 = vld [vmem:[%s2552_s21 + $0x40] sm:$0xf] }
  0x28   : > { %689 = vmatpush.bf16.msra.mxu0 %v2124_v6  ;;  %2158 = vmatpush.bf16.msra.mxu3 %v2124_v6  ;;  %v2118_v47 = vld [vmem:[%s2552_s21 + $0x74] sm:$0xf]  ;;  %v1911_v48 = vld [vmem:[%s2552_s21 + $0x78] sm:$0xf0]  ;;  %v1882_v50 = vor.u32 %v2110_v45, %v1879_v46  ;;  %v2113_v53 = vld [vmem:[%s2552_s21 + $0x44] sm:$0xf0] }
  0x29   : > { %738 = vmatpush.bf16.msra.mxu1 %v2132_v7  ;;  %v1914_v51 = vor.u32 %v2118_v47, %v1911_v48  ;;  %v2112_v54 = vld [vmem:[%s2552_s21 + $0x44] sm:$0xf]  ;;  %v1887_v55 = vld [vmem:[%s2552_s21 + $0x48] sm:$0xf0]  ;;  %v1886_v56 = vor.u32 %v2113_v53, %v1885_v52  ;;  %v1893_v58 = vld [vmem:[%s2552_s21 + $0x50] sm:$0xf] }
  0x2a   : > { %v1890_v57 = vor.u32 %v2112_v54, %v1887_v55  ;;  %v2115_v59 = vld [vmem:[%s2552_s21 + $0x54] sm:$0xf0]  ;;  %v2114_v60 = vld [vmem:[%s2552_s21 + $0x54] sm:$0xf]  ;;  %v1895_v61 = vld [vmem:[%s2552_s21 + $0x58] sm:$0xf0]  ;;  %s1743_s21 = scalar_lea.hbm %s2947_s13, %s2952_s19 }
  0x2b   : > { %v1894_v62 = vor.u32 %v2115_v59, %v1893_v58  ;;  %v1898_v63 = vor.u32 %v2114_v60, %v1895_v61  ;;  %v2139_v0 = vld [vmem:[%s2937_s3 + $0x18] sm:$0xff]  ;;  %v2137_v2 = vld [vmem:[%s2937_s3 + $0x8] sm:$0xff]  ;;  %v2607_v6 = vld [vmem:[%s2936_s2] ss:$0 sm:$0xff]  ;;  %s1746_s23 = sshll.u32 %s1743_s21, 4  ;;  %s1747_s23 = int_to_ptr.hbm [resolvable:$true] %s1746_s23 }
  0x2c   : > { %690 = vmatpush.bf16.msra.mxu0 %v2123_v8  ;;  %2159 = vmatpush.bf16.msra.mxu3 %v2123_v8  ;;  %v2619_v19 = vld [vmem:[%s2939_s5 + $0x18] sm:$0xff]  ;;  %v2637_v43 = vld [vmem:[%s2939_s5 + $0x10] sm:$0xff]  ;;  %s2304_s14 = sshra.s32 %s1747_s23, 4  ;;  %s2305_s14 = int_to_ptr.hbm [resolvable:$true] %s2304_s14 }
  0x2d   : > { %739 = vmatpush.bf16.msra.mxu1 %v2131_v9  ;;  %873 = vmatpush.bf16.msra.mxu2 %v2139_v0  ;;  %p2311_p0 = scmp.lt.s32.totalorder %s2305_s14, %s2947_s13 }
  0x30   : > { %691 = vmatpush.bf16.msra.mxu0 %v2122_v10  ;;  %2160 = vmatpush.bf16.msra.mxu3 %v2122_v10 }
  0x31   : > { %740 = vmatpush.bf16.msra.mxu1 %v2130_v11 }
  0x34   : > { %692 = vmatpush.bf16.msra.mxu0 %v2121_v12  ;;  %2161 = vmatpush.bf16.msra.mxu3 %v2121_v12 }
  0x35   : > { %741 = vmatpush.bf16.msra.mxu1 %v2129_v13 }
  0x38   : > { %693 = vmatpush.bf16.msra.mxu0 %v2120_v14  ;;  %2162 = vmatpush.bf16.msra.mxu3 %v2120_v14 }
  0x39   : > { %742 = vmatpush.bf16.msra.mxu1 %v2128_v15 }
  0x3b   : > { %694 = vmatmul.bf16.vlgmr.msra.gmra.mxu0 %v1854_v22  ;;  %724 = vmatmul.bf16.vlgmr.msra.gmra.mxu3 %v1902_v24 }
  0x3c   : > { %2163 = vmatpush.bf16.msrb.mxu3 %v2135_v1  ;;  %743 = vmatmul.bf16.vlgmr.msra.gmra.mxu1 %v1858_v23  ;;  %v2138_v1 = vld [vmem:[%s2937_s3 + $0x10] sm:$0xff] }
  0x3d   : > { %874 = vmatpush.bf16.msra.mxu2 %v2138_v1 }
  0x40   : > { %2164 = vmatpush.bf16.msrb.mxu3 %v2134_v3  ;;  %v2136_v3 = vld [vmem:[%s2937_s3] sm:$0xff] }
  0x41   : > { %875 = vmatpush.bf16.msra.mxu2 %v2137_v2 }
  0x44   : > { %2165 = vmatpush.bf16.msrb.mxu3 %v2133_v5 }
  0x45   : > { %876 = vmatpush.bf16.msra.mxu2 %v2136_v3 }
  0x48   : > { %2166 = vmatpush.bf16.msrb.mxu3 %v2132_v7 }
  0x49   : > { %1091 = vmatpush.bf16.msrb.mxu2 %v2619_v19 }
  0x4b   : > { %699 = vmatmul.bf16.gmra.mxu0 %v1862_v31  ;;  %729 = vmatmul.bf16.gmra.mxu3 %v1910_v33 }
  0x4c   : > { %2167 = vmatpush.bf16.msrb.mxu3 %v2131_v9  ;;  %748 = vmatmul.bf16.gmra.mxu1 %v1866_v32 }
  0x4d   : > { %1092 = vmatpush.bf16.msrb.mxu2 %v2637_v43 }
  0x50   : > { %2168 = vmatpush.bf16.msrb.mxu3 %v2130_v11 }
  0x54   : > { %2169 = vmatpush.bf16.msrb.mxu3 %v2129_v13 }
  0x58   : > { %2170 = vmatpush.bf16.msrb.mxu3 %v2128_v15 }
  0x5b   : > { %704 = vmatmul.bf16.gmra.mxu0 %v1870_v40  ;;  %773 = vmatmul.bf16.vlgmr.msrb.gmra.mxu3 %v1906_v42 }
  0x5c   : > { %753 = vmatmul.bf16.gmra.mxu1 %v1874_v41 }
  0x6b   : > { %709 = vmatmul.bf16.gmra.mxu0 %v1878_v49  ;;  %778 = vmatmul.bf16.gmra.mxu3 %v1914_v51 }
  0x6c   : > { %758 = vmatmul.bf16.gmra.mxu1 %v1882_v50 }
  0x7b   : > { %714 = vmatmul.bf16.gmra.mxu0 %v1886_v56 }
  0x7c   : > { %763 = vmatmul.bf16.gmra.mxu1 %v1890_v57 }
  0x8b   : > { %719 = vmatmul.bf16.gmra.mxu0 %v1894_v62 }
  0x8c   : > { %768 = vmatmul.bf16.gmra.mxu1 %v1898_v63 }
  0xb8   : > { %v695_v4 = vpop.f32.mrf.mxu0 }
  0xb9   : > { %v744_v5 = vpop.f32.mrf.mxu1  ;;  %v696_v7 = vadd.f32 %v2607_v6, %v695_v4  ;;  %v2141_v4 = vld [vmem:[%s2939_s5 + $0x8] sm:$0xff] }
  0xba   : > { %1093 = vmatpush.bf16.msrb.mxu2 %v2141_v4 }
  0xbb   : > { %v745_v10 = vadd.f32 %v744_v5, %v696_v7 }
  0xbd   : > { %v784_v13 = vmax.f32 %v745_v10, 0.0 }
  0xbe   : > { %v725_v36 = vpop.f32.mrf.mxu3 }
  0xc0   : > { %v697_v8 = vpop.f32.mrf.mxu0 }
  0xc1   : > { %v746_v9 = vpop.f32.mrf.mxu1  ;;  %v698_v11 = vadd.f32 %v2607_v6, %v697_v8 }
  0xc3   : > { %v747_v12 = vadd.f32 %v746_v9, %v698_v11 }
  0xc5   : > { %v785_v14 = vmax.f32 %v747_v12, 0.0 }
  0xc6   : > { %v727_v44 = vpop.f32.mrf.mxu3 }
  0xc7   : > { %v2611_v15 = vpack.c.bf16 %v785_v14, %v784_v13 }
  0xc8   : > { %v700_v16 = vpop.f32.mrf.mxu0 }
  0xc9   : > { %v749_v17 = vpop.f32.mrf.mxu1  ;;  %1995 = vmatmul.msk.bf16.vlgmr.msra.gmra.mxu2 %vm844_vm0, %v2611_v15  ;;  %v701_v18 = vadd.f32 %v2607_v6, %v700_v16 }
  0xcb   : > { %v750_v22 = vadd.f32 %v749_v17, %v701_v18  ;;  %v2151_v18 = vld [vmem:[%s2940_s6 + $0x38] sm:$0xff] }
  0xcc   : > { %1014 = vmatpush.bf16.msra.mxu3 %v2151_v18 }
  0xcd   : > { %v786_v25 = vmax.f32 %v750_v22, 0.0  ;;  %v728_v22 = vadd.f32 %v2607_v6, %v727_v44 }
  0xce   : > { %v730_v55 = vpop.f32.mrf.mxu3 }
  0xd0   : > { %v702_v20 = vpop.f32.mrf.mxu0 }
  0xd1   : > { %v751_v21 = vpop.f32.mrf.mxu1  ;;  %v703_v23 = vadd.f32 %v2607_v6, %v702_v20  ;;  %v2140_v20 = vld [vmem:[%s2939_s5] sm:$0xff] }
  0xd2   : > { %1094 = vmatpush.bf16.msrb.mxu2 %v2140_v20 }
  0xd3   : > { %v752_v24 = vadd.f32 %v751_v21, %v703_v23  ;;  %v726_v21 = vadd.f32 %v2607_v6, %v725_v36  ;;  %v2150_v23 = vld [vmem:[%s2940_s6 + $0x30] sm:$0xff] }
  0xd4   : > { %1015 = vmatpush.bf16.msra.mxu3 %v2150_v23 }
  0xd5   : > { %v787_v26 = vmax.f32 %v752_v24, 0.0 }
  0xd6   : > { %v732_v62 = vpop.f32.mrf.mxu3 }
  0xd7   : > { %v2623_v27 = vpack.c.bf16 %v787_v26, %v786_v25  ;;  %v2149_v26 = vld [vmem:[%s2940_s6 + $0x28] sm:$0xff] }
  0xd8   : > { %v705_v28 = vpop.f32.mrf.mxu0  ;;  %1016 = vmatpush.bf16.msra.mxu3 %v2149_v26 }
  0xd9   : > { %v754_v29 = vpop.f32.mrf.mxu1  ;;  %1996 = vmatmul.msk.bf16.gmra.mxu2 %vm844_vm0, %v2623_v27  ;;  %v706_v30 = vadd.f32 %v2607_v6, %v705_v28 }
  0xdb   : > { %v755_v33 = vadd.f32 %v754_v29, %v706_v30 }
  0xdd   : > { %v788_v37 = vmax.f32 %v755_v33, 0.0  ;;  %v2147_v33 = vld [vmem:[%s2940_s6 + $0x18] sm:$0xff] }
  0xde   : > { %v774_v7 = vpop.f32.mrf.mxu3 }
  0xdf   : > { %v775_v24 = vadd.f32 %v774_v7, %v726_v21 }
  0xe0   : > { %v707_v31 = vpop.f32.mrf.mxu0 }
  0xe1   : > { %v756_v32 = vpop.f32.mrf.mxu1  ;;  %v708_v34 = vadd.f32 %v2607_v6, %v707_v31  ;;  %v796_v29 = vmax.f32 %v775_v24, 0.0  ;;  %v2148_v31 = vld [vmem:[%s2940_s6 + $0x20] sm:$0xff] }
  0xe2   : > { %1017 = vmatpush.bf16.msra.mxu3 %v2148_v31 }
  0xe3   : > { %v757_v35 = vadd.f32 %v756_v32, %v708_v34  ;;  %v731_v34 = vadd.f32 %v2607_v6, %v730_v55 }
  0xe5   : > { %v789_v38 = vmax.f32 %v757_v35, 0.0  ;;  %v733_v35 = vadd.f32 %v2607_v6, %v732_v62 }
  0xe6   : > { %v776_v17 = vpop.f32.mrf.mxu3  ;;  %1018 = vmatpush.bf16.msra.mxu3 %v2147_v33 }
  0xe7   : > { %v2629_v39 = vpack.c.bf16 %v789_v38, %v788_v37  ;;  %v777_v25 = vadd.f32 %v776_v17, %v728_v22  ;;  %v2146_v37 = vld [vmem:[%s2940_s6 + $0x10] sm:$0xff] }
  0xe8   : > { %v710_v40 = vpop.f32.mrf.mxu0 }
  0xe9   : > { %v759_v41 = vpop.f32.mrf.mxu1  ;;  %1997 = vmatmul.msk.bf16.gmra.mxu2 %vm844_vm0, %v2629_v39  ;;  %v711_v42 = vadd.f32 %v2607_v6, %v710_v40  ;;  %v797_v30 = vmax.f32 %v777_v25, 0.0 }
  0xea   : > { %1019 = vmatpush.bf16.msra.mxu3 %v2146_v37 }
  0xeb   : > { %v760_v47 = vadd.f32 %v759_v41, %v711_v42  ;;  %v2677_v32 = vpack.c.bf16 %v797_v30, %v796_v29  ;;  %v2145_v41 = vld [vmem:[%s2940_s6 + $0x8] sm:$0xff] }
  0xed   : > { %v790_v50 = vmax.f32 %v760_v47, 0.0 }
  0xee   : > { %v779_v28 = vpop.f32.mrf.mxu3  ;;  %1020 = vmatpush.bf16.msra.mxu3 %v2145_v41 }
  0xef   : > { %v780_v38 = vadd.f32 %v779_v28, %v731_v34 }
  0xf0   : > { %v712_v45 = vpop.f32.mrf.mxu0 }
  0xf1   : > { %v761_v46 = vpop.f32.mrf.mxu1  ;;  %v713_v48 = vadd.f32 %v2607_v6, %v712_v45  ;;  %v798_v42 = vmax.f32 %v780_v38, 0.0 }
  0xf3   : > { %v762_v49 = vadd.f32 %v761_v46, %v713_v48  ;;  %v2709_v46 = vld [vmem:[%s2938_s4] ss:$0 sm:$0xff] }
  0xf5   : > { %v791_v51 = vmax.f32 %v762_v49, 0.0 }
  0xf6   : > { %v781_v36 = vpop.f32.mrf.mxu3 }
  0xf7   : > { %v2641_v52 = vpack.c.bf16 %v791_v51, %v790_v50  ;;  %v782_v40 = vadd.f32 %v781_v36, %v733_v35 }
  0xf8   : > { %v715_v53 = vpop.f32.mrf.mxu0 }
  0xf9   : > { %v764_v54 = vpop.f32.mrf.mxu1  ;;  %1998 = vmatmul.msk.bf16.gmra.mxu2 %vm844_vm0, %v2641_v52  ;;  %v716_v56 = vadd.f32 %v2607_v6, %v715_v53  ;;  %v799_v44 = vmax.f32 %v782_v40, 0.0 }
  0xfb   : > { %v765_v59 = vadd.f32 %v764_v54, %v716_v56  ;;  %v2695_v45 = vpack.c.bf16 %v799_v44, %v798_v42 }
  0xfd   : > { %v792_v63 = vmax.f32 %v765_v59, 0.0 }
 0x100   : > { %v717_v57 = vpop.f32.mrf.mxu0 }
 0x101   : > { %v766_v58 = vpop.f32.mrf.mxu1  ;;  %v718_v60 = vadd.f32 %v2607_v6, %v717_v57 }
 0x103   : > { %v767_v61 = vadd.f32 %v766_v58, %v718_v60 }
 0x105   : > { %v793_v0 = vmax.f32 %v767_v61, 0.0 }
 0x107   : > { %v2647_v1 = vpack.c.bf16 %v793_v0, %v792_v63 }
 0x108   : > { %v720_v2 = vpop.f32.mrf.mxu0 }
 0x109   : > { %v769_v3 = vpop.f32.mrf.mxu1  ;;  %1999 = vmatmul.msk.bf16.gmra.mxu2 %vm844_vm0, %v2647_v1  ;;  %v721_v5 = vadd.f32 %v2607_v6, %v720_v2 }
 0x10b   : > { %v770_v9 = vadd.f32 %v769_v3, %v721_v5 }
 0x10d   : > { %v794_v13 = vmax.f32 %v770_v9, 0.0 }
 0x110   : > { %v722_v8 = vpop.f32.mrf.mxu0 }
 0x111   : > { %v723_v10 = vadd.f32 %v2607_v6, %v722_v8  ;;  %v771_v11 = vpop.f32.mrf.mxu1  ;;  %v2144_v6 = vld [vmem:[%s2940_s6] sm:$0xff] }
 0x112   : > { %1021 = vmatpush.bf16.msra.mxu3 %v2144_v6 }
 0x113   : > { %v772_v12 = vadd.f32 %v771_v11, %v723_v10 }
 0x115   : > { %v795_v14 = vmax.f32 %v772_v12, 0.0 }
 0x116   : > { %2171 = vmatpush.bf16.msrb.mxu3 %v2619_v19 }
 0x117   : > { %v2656_v16 = vpack.c.bf16 %v795_v14, %v794_v13 }
 0x119   : > { %2000 = vmatmul.msk.bf16.gmra.mxu2 %vm844_vm0, %v2656_v16 }
 0x11a   : > { %2172 = vmatpush.bf16.msrb.mxu3 %v2637_v43 }
 0x11e   : > { %2173 = vmatpush.bf16.msrb.mxu3 %v2141_v4  ;;  %v2152_v4 = vld [vmem:[%s2942_s8] sm:$0xff] }
 0x11f   : > { %1224 = vmatpush.bf16.msrb.mxu0 %v2152_v4 }
 0x122   : > { %2174 = vmatpush.bf16.msrb.mxu3 %v2140_v20 }
 0x129   : > { %2001 = vmatmul.msk.bf16.gmra.mxu2 %vm844_vm0, %v2677_v32 }
 0x139   : > { %2002 = vmatmul.msk.bf16.gmra.mxu2 %vm844_vm0, %v2695_v45 }
 0x149   : > { %2051 = vmatmul.msk.bf16.vlgmr.msrb.gmra.mxu2 %vm844_vm0, %v2611_v15 }
 0x14c   : > { %v878_v47 = vpop.f32.mrf.mxu2 }
 0x14d   : > { %v879_v19 = vadd.f32 %v2709_v46, %v878_v47  ;;  %v2768_v47 = vld [vmem:[%s2941_s7] ss:$0 sm:$0xff] }
 0x14f   : > { %v918_v48 = vmax.f32 %v879_v19, 0.0 }
 0x151   : > { %1693 = vst [vmem:[%s2715_s15] sm:$0xff] %v918_v48 }
 0x154   : > { %v880_v43 = vpop.f32.mrf.mxu2 }
 0x155   : > { %v881_v15 = vadd.f32 %v2709_v46, %v880_v43 }
 0x157   : > { %v919_v49 = vmax.f32 %v881_v15, 0.0 }
 0x159   : > { %v942_v50 = vpack.c.bf16 %v919_v49, %v918_v48  ;;  %1694 = vst [vmem:[%s2715_s15 + $0x8] sm:$0xff] %v919_v49  ;;  %2052 = vmatmul.msk.bf16.gmra.mxu2 %vm844_vm0, %v2623_v27 }
 0x15b   : > { %1022 = vmatmul.bf16.vlgmr.msra.gmra.mxu3 %v942_v50 }
 0x15c   : > { %v883_v51 = vpop.f32.mrf.mxu2 }
 0x15d   : > { %v884_v53 = vadd.f32 %v2709_v46, %v883_v51 }
 0x15f   : > { %v920_v54 = vmax.f32 %v884_v53, 0.0 }
 0x161   : > { %1695 = vst [vmem:[%s2715_s15 + $0x10] sm:$0xff] %v920_v54 }
 0x164   : > { %v885_v55 = vpop.f32.mrf.mxu2 }
 0x165   : > { %v886_v56 = vadd.f32 %v2709_v46, %v885_v55 }
 0x167   : > { %v921_v57 = vmax.f32 %v886_v56, 0.0 }
 0x169   : > { %1696 = vst [vmem:[%s2715_s15 + $0x18] sm:$0xff] %v921_v57  ;;  %2053 = vmatmul.msk.bf16.gmra.mxu2 %vm844_vm0, %v2629_v39  ;;  %v943_v58 = vpack.c.bf16 %v921_v57, %v920_v54 }
 0x16b   : > { %1027 = vmatmul.bf16.gmra.mxu3 %v943_v58 }
 0x16c   : > { %v888_v27 = vpop.f32.mrf.mxu2 }
 0x16d   : > { %v889_v59 = vadd.f32 %v2709_v46, %v888_v27 }
 0x16f   : > { %v922_v60 = vmax.f32 %v889_v59, 0.0 }
 0x171   : > { %1697 = vst [vmem:[%s2715_s15 + $0x20] sm:$0xff] %v922_v60 }
 0x174   : > { %v890_v61 = vpop.f32.mrf.mxu2 }
 0x175   : > { %v891_v62 = vadd.f32 %v2709_v46, %v890_v61 }
 0x177   : > { %v923_v63 = vmax.f32 %v891_v62, 0.0 }
 0x179   : > { %1698 = vst [vmem:[%s2715_s15 + $0x28] sm:$0xff] %v923_v63  ;;  %2054 = vmatmul.msk.bf16.gmra.mxu2 %vm844_vm0, %v2641_v52  ;;  %v944_v0 = vpack.c.bf16 %v923_v63, %v922_v60 }
 0x17b   : > { %1032 = vmatmul.bf16.gmra.mxu3 %v944_v0 }
 0x17c   : > { %v893_v39 = vpop.f32.mrf.mxu2 }
 0x17d   : > { %v894_v2 = vadd.f32 %v2709_v46, %v893_v39 }
 0x17f   : > { %v924_v3 = vmax.f32 %v894_v2, 0.0 }
 0x181   : > { %1699 = vst [vmem:[%s2715_s15 + $0x30] sm:$0xff] %v924_v3 }
 0x184   : > { %v895_v5 = vpop.f32.mrf.mxu2 }
 0x185   : > { %v896_v7 = vadd.f32 %v2709_v46, %v895_v5 }
 0x187   : > { %v925_v8 = vmax.f32 %v896_v7, 0.0 }
 0x189   : > { %1700 = vst [vmem:[%s2715_s15 + $0x38] sm:$0xff] %v925_v8  ;;  %2055 = vmatmul.msk.bf16.gmra.mxu2 %vm844_vm0, %v2647_v1  ;;  %v945_v52 = vpack.c.bf16 %v925_v8, %v924_v3 }
 0x18b   : > { %1037 = vmatmul.bf16.gmra.mxu3 %v945_v52  ;;  %v1290_v52 = vld [vmem:[%s2944_s10] sm:$0x3] }
 0x18c   : > { %v898_v9 = vpop.f32.mrf.mxu2 }
 0x18d   : > { %v899_v10 = vadd.f32 %v2709_v46, %v898_v9  ;;  %v1322_v9 = vsel %vm1320_vm2, %v1290_v52, 0 }
 0x18e   : > { %1331 = vmatpush.bf16.msrb.mxu1 %v1322_v9 }
 0x18f   : > { %v926_v11 = vmax.f32 %v899_v10, 0.0 }
 0x191   : > { %1701 = vst [vmem:[%s2715_s15 + $0x40] sm:$0xff] %v926_v11 }
 0x194   : > { %v900_v12 = vpop.f32.mrf.mxu2 }
 0x195   : > { %v901_v13 = vadd.f32 %v2709_v46, %v900_v12 }
 0x197   : > { %v927_v14 = vmax.f32 %v901_v13, 0.0 }
 0x199   : > { %1702 = vst [vmem:[%s2715_s15 + $0x48] sm:$0xff] %v927_v14  ;;  %2056 = vmatmul.msk.bf16.gmra.mxu2 %vm844_vm0, %v2656_v16  ;;  %v946_v17 = vpack.c.bf16 %v927_v14, %v926_v11 }
 0x19b   : > { %1042 = vmatmul.bf16.gmra.mxu3 %v946_v17 }
 0x19c   : > { %v903_v1 = vpop.f32.mrf.mxu2 }
 0x19d   : > { %v904_v18 = vadd.f32 %v2709_v46, %v903_v1 }
 0x19f   : > { %v928_v20 = vmax.f32 %v904_v18, 0.0 }
 0x1a1   : > { %1703 = vst [vmem:[%s2715_s15 + $0x50] sm:$0xff] %v928_v20 }
 0x1a4   : > { %v905_v21 = vpop.f32.mrf.mxu2 }
 0x1a5   : > { %v906_v22 = vadd.f32 %v2709_v46, %v905_v21 }
 0x1a7   : > { %v929_v23 = vmax.f32 %v906_v22, 0.0 }
 0x1a9   : > { %1704 = vst [vmem:[%s2715_s15 + $0x58] sm:$0xff] %v929_v23  ;;  %2057 = vmatmul.msk.bf16.gmra.mxu2 %vm844_vm0, %v2677_v32  ;;  %v947_v24 = vpack.c.bf16 %v929_v23, %v928_v20 }
 0x1ab   : > { %1047 = vmatmul.bf16.gmra.mxu3 %v947_v24 }
 0x1ac   : > { %v908_v16 = vpop.f32.mrf.mxu2 }
 0x1ad   : > { %v909_v25 = vadd.f32 %v2709_v46, %v908_v16 }
 0x1af   : > { %v930_v26 = vmax.f32 %v909_v25, 0.0 }
 0x1b1   : > { %1705 = vst [vmem:[%s2715_s15 + $0x60] sm:$0xff] %v930_v26 }
 0x1b4   : > { %v910_v28 = vpop.f32.mrf.mxu2 }
 0x1b5   : > { %v911_v29 = vadd.f32 %v2709_v46, %v910_v28 }
 0x1b7   : > { %v931_v30 = vmax.f32 %v911_v29, 0.0 }
 0x1b9   : > { %1706 = vst [vmem:[%s2715_s15 + $0x68] sm:$0xff] %v931_v30  ;;  %v948_v31 = vpack.c.bf16 %v931_v30, %v930_v26 }
 0x1bb   : > { %1052 = vmatmul.bf16.gmra.mxu3 %v948_v31 }
 0x1bc   : > { %v913_v33 = vpop.f32.mrf.mxu2 }
 0x1bd   : > { %v914_v34 = vadd.f32 %v2709_v46, %v913_v33 }
 0x1bf   : > { %v932_v32 = vmax.f32 %v914_v34, 0.0 }
 0x1c1   : > { %1707 = vst [vmem:[%s2715_s15 + $0x70] sm:$0xff] %v932_v32 }
 0x1c4   : > { %v915_v35 = vpop.f32.mrf.mxu2 }
 0x1c5   : > { %v916_v36 = vadd.f32 %v2709_v46, %v915_v35 }
 0x1c7   : > { %v933_v37 = vmax.f32 %v916_v36, 0.0 }
 0x1c9   : > { %1708 = vst [vmem:[%s2715_s15 + $0x78] sm:$0xff] %v933_v37  ;;  %v949_v38 = vpack.c.bf16 %v933_v37, %v932_v32  ;;  %s2306_s15 = scalar_lea.hbm %s2305_s14, 128 }
 0x1ca   : > { %p2307_p11 = scmp.ne.s32.totalorder %s2305_s14, %s2306_s15  ;;  %p2312_p1 = scmp.lt.s32.totalorder %s2310_s20, %s2306_s15 }
 0x1cb   : > { %1057 = vmatmul.bf16.gmra.mxu3 %v949_v38 }
 0x1cc   : > { %v1096_v40 = vpop.f32.mrf.mxu2  ;;  %p2308_p12 = pnand %p2307_p11, %p2496_p5  ;;  %p2313_p2 = por %p2312_p1, %p2311_p0 }
 0x1ce   : > { %p2309_p13 = pneg %p2308_p12 }
 0x1d0   : > { %p2314_p3 = pnand %p2313_p2, %p2309_p13 }
 0x1d4   : > { %v1098_v41 = vpop.f32.mrf.mxu2 }
 0x1db   : > { %2058 = vmatmul.msk.bf16.vlgmr.msrb.gmra.mxu3 %vm844_vm0, %v2695_v45 }
 0x1dc   : > { %v1101_v42 = vpop.f32.mrf.mxu2 }
 0x1de   : > { %v1023_v44 = vpop.f32.mrf.mxu3 }
 0x1df   : > { %v1097_v6 = vadd.f32 %v1096_v40, %v1023_v44 }
 0x1e1   : > { %v1140_v46 = vadd.f32 %v2768_v47, %v1097_v6 }
 0x1e3   : > { %v1156_v49 = vmax.f32 %v1140_v46, 0.0 }
 0x1e4   : > { %v1103_v19 = vpop.f32.mrf.mxu2 }
 0x1e6   : > { %v1025_v48 = vpop.f32.mrf.mxu3 }
 0x1e7   : > { %v1099_v43 = vadd.f32 %v1098_v41, %v1025_v48 }
 0x1e9   : > { %v1141_v15 = vadd.f32 %v2768_v47, %v1099_v43 }
 0x1eb   : > { %v1157_v50 = vmax.f32 %v1141_v15, 0.0 }
 0x1ec   : > { %v1106_v51 = vpop.f32.mrf.mxu2 }
 0x1ed   : > { %v1172_v45 = vpack.c.bf16 %v1157_v50, %v1156_v49 }
 0x1ee   : > { %v1028_v53 = vpop.f32.mrf.mxu3 }
 0x1ef   : > { %2063 = vmatmul.msk.bf16.vlgmr.msrb.gmra.mxu0 %vm1192_vm1, %v1172_v45  ;;  %v1102_v54 = vadd.f32 %v1101_v42, %v1028_v53 }
 0x1f1   : > { %v1142_v57 = vadd.f32 %v2768_v47, %v1102_v54 }
 0x1f3   : > { %v1158_v59 = vmax.f32 %v1142_v57, 0.0 }
 0x1f4   : > { %v1108_v55 = vpop.f32.mrf.mxu2 }
 0x1f6   : > { %v1030_v56 = vpop.f32.mrf.mxu3 }
 0x1f7   : > { %v1104_v58 = vadd.f32 %v1103_v19, %v1030_v56 }
 0x1f9   : > { %v1143_v27 = vadd.f32 %v2768_v47, %v1104_v58 }
 0x1fb   : > { %v1159_v60 = vmax.f32 %v1143_v27, 0.0 }
 0x1fc   : > { %v1111_v63 = vpop.f32.mrf.mxu2 }
 0x1fd   : > { %v1173_v61 = vpack.c.bf16 %v1159_v60, %v1158_v59 }
 0x1fe   : > { %v1033_v62 = vpop.f32.mrf.mxu3 }
 0x1ff   : > { %2064 = vmatmul.msk.bf16.gmra.mxu0 %vm1192_vm1, %v1173_v61  ;;  %v1107_v0 = vadd.f32 %v1106_v51, %v1033_v62 }
 0x201   : > { %v1144_v2 = vadd.f32 %v2768_v47, %v1107_v0 }
 0x203   : > { %v1160_v7 = vmax.f32 %v1144_v2, 0.0  ;;  %v2224_v2 = vld [vmem:[%s2943_s9] ss:$0 sm:$0xff] }
 0x204   : > { %v1113_v5 = vpop.f32.mrf.mxu2 }
 0x206   : > { %v1035_v39 = vpop.f32.mrf.mxu3 }
 0x207   : > { %v1109_v3 = vadd.f32 %v1108_v55, %v1035_v39 }
 0x209   : > { %v1145_v4 = vadd.f32 %v2768_v47, %v1109_v3 }
 0x20b   : > { %v1161_v8 = vmax.f32 %v1145_v4, 0.0 }
 0x20c   : > { %v1116_v13 = vpop.f32.mrf.mxu2 }
 0x20d   : > { %v1174_v10 = vpack.c.bf16 %v1161_v8, %v1160_v7 }
 0x20e   : > { %v1038_v11 = vpop.f32.mrf.mxu3 }
 0x20f   : > { %2065 = vmatmul.msk.bf16.gmra.mxu0 %vm1192_vm1, %v1174_v10  ;;  %v1112_v12 = vadd.f32 %v1111_v63, %v1038_v11 }
 0x211   : > { %v1146_v17 = vadd.f32 %v2768_v47, %v1112_v12 }
 0x213   : > { %v1162_v20 = vmax.f32 %v1146_v17, 0.0 }
 0x214   : > { %v1118_v23 = vpop.f32.mrf.mxu2 }
 0x216   : > { %v1040_v14 = vpop.f32.mrf.mxu3 }
 0x217   : > { %v1114_v1 = vadd.f32 %v1113_v5, %v1040_v14 }
 0x219   : > { %v1147_v18 = vadd.f32 %v2768_v47, %v1114_v1 }
 0x21b   : > { %v1163_v21 = vmax.f32 %v1147_v18, 0.0 }
 0x21c   : > { %v1121_v29 = vpop.f32.mrf.mxu2 }
 0x21d   : > { %v1175_v22 = vpack.c.bf16 %v1163_v21, %v1162_v20 }
 0x21e   : > { %v1043_v24 = vpop.f32.mrf.mxu3 }
 0x21f   : > { %2066 = vmatmul.msk.bf16.gmra.mxu0 %vm1192_vm1, %v1175_v22  ;;  %v1117_v16 = vadd.f32 %v1116_v13, %v1043_v24 }
 0x221   : > { %v1148_v26 = vadd.f32 %v2768_v47, %v1117_v16 }
 0x223   : > { %v1164_v31 = vmax.f32 %v1148_v26, 0.0 }
 0x224   : > { %v1123_v35 = vpop.f32.mrf.mxu2 }
 0x226   : > { %v1045_v25 = vpop.f32.mrf.mxu3 }
 0x227   : > { %v1119_v28 = vadd.f32 %v1118_v23, %v1045_v25 }
 0x229   : > { %v1149_v30 = vadd.f32 %v2768_v47, %v1119_v28 }
 0x22b   : > { %v1165_v33 = vmax.f32 %v1149_v30, 0.0 }
 0x22c   : > { %v1126_v6 = vpop.f32.mrf.mxu2 }
 0x22d   : > { %v1176_v34 = vpack.c.bf16 %v1165_v33, %v1164_v31 }
 0x22e   : > { %v1048_v32 = vpop.f32.mrf.mxu3 }
 0x22f   : > { %2067 = vmatmul.msk.bf16.gmra.mxu0 %vm1192_vm1, %v1176_v34  ;;  %v1122_v36 = vadd.f32 %v1121_v29, %v1048_v32 }
 0x231   : > { %v1150_v38 = vadd.f32 %v2768_v47, %v1122_v36 }
 0x233   : > { %v1166_v42 = vmax.f32 %v1150_v38, 0.0 }
 0x234   : > { %v1128_v43 = vpop.f32.mrf.mxu2 }
 0x236   : > { %v1050_v37 = vpop.f32.mrf.mxu3 }
 0x237   : > { %v1124_v40 = vadd.f32 %v1123_v35, %v1050_v37 }
 0x239   : > { %v1151_v41 = vadd.f32 %v2768_v47, %v1124_v40 }
 0x23b   : > { %v1167_v44 = vmax.f32 %v1151_v41, 0.0 }
 0x23d   : > { %v1177_v19 = vpack.c.bf16 %v1167_v44, %v1166_v42 }
 0x23e   : > { %v1053_v48 = vpop.f32.mrf.mxu3 }
 0x23f   : > { %2068 = vmatmul.msk.bf16.gmra.mxu0 %vm1192_vm1, %v1177_v19  ;;  %v1127_v46 = vadd.f32 %v1126_v6, %v1053_v48 }
 0x241   : > { %v1152_v49 = vadd.f32 %v2768_v47, %v1127_v46 }
 0x243   : > { %v1168_v45 = vmax.f32 %v1152_v49, 0.0 }
 0x246   : > { %v1055_v15 = vpop.f32.mrf.mxu3 }
 0x247   : > { %v1129_v50 = vadd.f32 %v1128_v43, %v1055_v15 }
 0x249   : > { %v1153_v51 = vadd.f32 %v2768_v47, %v1129_v50 }
 0x24b   : > { %v1169_v53 = vmax.f32 %v1153_v51, 0.0 }
 0x24d   : > { %v1178_v54 = vpack.c.bf16 %v1169_v53, %v1168_v45 }
 0x24e   : > { %v1058_v55 = vpop.f32.mrf.mxu3 }
 0x24f   : > { %2069 = vmatmul.msk.bf16.gmra.mxu0 %vm1192_vm1, %v1178_v54 }
 0x256   : > { %v1060_v56 = vpop.f32.mrf.mxu3 }
 0x25e   : > { %v1131_v57 = vpop.f32.mrf.mxu3 }
 0x25f   : > { %v1132_v58 = vadd.f32 %v1131_v57, %v1058_v55 }
 0x261   : > { %v1154_v59 = vadd.f32 %v2768_v47, %v1132_v58 }
 0x263   : > { %v1170_v62 = vmax.f32 %v1154_v59, 0.0 }
 0x266   : > { %v1133_v27 = vpop.f32.mrf.mxu3 }
 0x267   : > { %v1134_v60 = vadd.f32 %v1133_v27, %v1060_v56  ;;  %v2810_v56 = vld [vmem:[%s2945_s11] ss:$0 sm:$0xff] }
 0x269   : > { %v1155_v61 = vadd.f32 %v2768_v47, %v1134_v60 }
 0x26b   : > { %v1171_v63 = vmax.f32 %v1155_v61, 0.0 }
 0x26c   : > { %v1226_v0 = vpop.f32.mrf.mxu0 }
 0x26d   : > { %v1179_v39 = vpack.c.bf16 %v1171_v63, %v1170_v62  ;;  %v1227_v3 = vadd.f32 %v2224_v2, %v1226_v0 }
 0x26f   : > { %2070 = vmatmul.msk.bf16.gmra.mxu0 %vm1192_vm1, %v1179_v39  ;;  %v1266_v7 = vmax.f32 %v1227_v3, 0.0 }
 0x274   : > { %v1228_v4 = vpop.f32.mrf.mxu0 }
 0x275   : > { %v1229_v5 = vadd.f32 %v2224_v2, %v1228_v4 }
 0x277   : > { %v1267_v8 = vmax.f32 %v1229_v5, 0.0 }
 0x279   : > { %v1282_v52 = vpack.c.bf16 %v1267_v8, %v1266_v7 }
 0x27b   : > { %2071 = vmatmul.msk.bf16.vlgmr.msrb.gmra.mxu1 %vm1295_vm3, %v1282_v52 }
 0x27c   : > { %v1231_v47 = vpop.f32.mrf.mxu0 }
 0x27d   : > { %v1232_v9 = vadd.f32 %v2224_v2, %v1231_v47 }
 0x27f   : > { %v1268_v12 = vmax.f32 %v1232_v9, 0.0 }
 0x284   : > { %v1233_v10 = vpop.f32.mrf.mxu0 }
 0x285   : > { %v1234_v11 = vadd.f32 %v2224_v2, %v1233_v10 }
 0x287   : > { %v1269_v13 = vmax.f32 %v1234_v11, 0.0 }
 0x289   : > { %v1283_v14 = vpack.c.bf16 %v1269_v13, %v1268_v12 }
 0x28b   : > { %2072 = vmatmul.msk.bf16.gmra.mxu1 %vm1295_vm3, %v1283_v14 }
 0x28c   : > { %v1236_v17 = vpop.f32.mrf.mxu0 }
 0x28d   : > { %v1237_v1 = vadd.f32 %v2224_v2, %v1236_v17 }
 0x28f   : > { %v1270_v21 = vmax.f32 %v1237_v1, 0.0 }
 0x294   : > { %v1238_v18 = vpop.f32.mrf.mxu0 }
 0x295   : > { %v1239_v20 = vadd.f32 %v2224_v2, %v1238_v18 }
 0x297   : > { %v1271_v22 = vmax.f32 %v1239_v20, 0.0 }
 0x299   : > { %v1284_v23 = vpack.c.bf16 %v1271_v22, %v1270_v21 }
 0x29b   : > { %2073 = vmatmul.msk.bf16.gmra.mxu1 %vm1295_vm3, %v1284_v23 }
 0x29c   : > { %v1241_v24 = vpop.f32.mrf.mxu0 }
 0x29d   : > { %v1242_v16 = vadd.f32 %v2224_v2, %v1241_v24 }
 0x29f   : > { %v1272_v28 = vmax.f32 %v1242_v16, 0.0 }
 0x2a4   : > { %v1243_v25 = vpop.f32.mrf.mxu0 }
 0x2a5   : > { %v1244_v26 = vadd.f32 %v2224_v2, %v1243_v25 }
 0x2a7   : > { %v1273_v29 = vmax.f32 %v1244_v26, 0.0 }
 0x2a9   : > { %v1285_v30 = vpack.c.bf16 %v1273_v29, %v1272_v28 }
 0x2ab   : > { %2074 = vmatmul.msk.bf16.gmra.mxu1 %vm1295_vm3, %v1285_v30 }
 0x2ac   : > { %v1246_v31 = vpop.f32.mrf.mxu0 }
 0x2ad   : > { %v1247_v33 = vadd.f32 %v2224_v2, %v1246_v31 }
 0x2af   : > { %v1274_v35 = vmax.f32 %v1247_v33, 0.0 }
 0x2b4   : > { %v1248_v34 = vpop.f32.mrf.mxu0 }
 0x2b5   : > { %v1249_v32 = vadd.f32 %v2224_v2, %v1248_v34 }
 0x2b7   : > { %v1275_v36 = vmax.f32 %v1249_v32, 0.0 }
 0x2b9   : > { %v1286_v37 = vpack.c.bf16 %v1275_v36, %v1274_v35 }
 0x2bb   : > { %2075 = vmatmul.msk.bf16.gmra.mxu1 %vm1295_vm3, %v1286_v37 }
 0x2bc   : > { %v1251_v38 = vpop.f32.mrf.mxu0 }
 0x2bd   : > { %v1252_v40 = vadd.f32 %v2224_v2, %v1251_v38 }
 0x2bf   : > { %v1276_v44 = vmax.f32 %v1252_v40, 0.0 }
 0x2c4   : > { %v1253_v41 = vpop.f32.mrf.mxu0 }
 0x2c5   : > { %v1254_v42 = vadd.f32 %v2224_v2, %v1253_v41 }
 0x2c7   : > { %v1277_v6 = vmax.f32 %v1254_v42, 0.0 }
 0x2c9   : > { %v1287_v19 = vpack.c.bf16 %v1277_v6, %v1276_v44 }
 0x2cb   : > { %2076 = vmatmul.msk.bf16.gmra.mxu1 %vm1295_vm3, %v1287_v19 }
 0x2cc   : > { %v1256_v48 = vpop.f32.mrf.mxu0 }
 0x2cd   : > { %v1257_v46 = vadd.f32 %v2224_v2, %v1256_v48 }
 0x2cf   : > { %v1278_v49 = vmax.f32 %v1257_v46, 0.0 }
 0x2d4   : > { %v1258_v43 = vpop.f32.mrf.mxu0 }
 0x2d5   : > { %v1259_v15 = vadd.f32 %v2224_v2, %v1258_v43 }
 0x2d7   : > { %v1279_v50 = vmax.f32 %v1259_v15, 0.0 }
 0x2d9   : > { %v1288_v51 = vpack.c.bf16 %v1279_v50, %v1278_v49 }
 0x2db   : > { %2077 = vmatmul.msk.bf16.gmra.mxu1 %vm1295_vm3, %v1288_v51 }
 0x2ec   : > { %v1261_v45 = vpop.f32.mrf.mxu0 }
 0x2ed   : > { %v1262_v53 = vadd.f32 %v2224_v2, %v1261_v45 }
 0x2ef   : > { %v1280_v57 = vmax.f32 %v1262_v53, 0.0 }
 0x2f4   : > { %v1263_v54 = vpop.f32.mrf.mxu0 }
 0x2f5   : > { %v1264_v55 = vadd.f32 %v2224_v2, %v1263_v54 }
 0x2f7   : > { %v1281_v58 = vmax.f32 %v1264_v55, 0.0 }
 0x2f8   : > { %v1333_v27 = vpop.f32.mrf.mxu1 }
 0x2f9   : > { %v1289_v59 = vpack.c.bf16 %v1281_v58, %v1280_v57  ;;  %v1334_v60 = vadd.f32 %v2810_v56, %v1333_v27 }
 0x2fb   : > { %v2079_v61 = vmul.f32 -1.442695, %v1334_v60  ;;  %2078 = vmatmul.msk.bf16.gmra.mxu1 %vm1295_vm3, %v1289_v59 }
 0x2fd   : > { %2226 = vpow2.f32 %v2079_v61 }
 0x300   : > { %v1335_v62 = vpop.f32.mrf.mxu1 }
 0x301   : > { %v1336_v63 = vadd.f32 %v2810_v56, %v1335_v62 }
 0x303   : > { %v2227_v0 = vpop.eup %2226  ;;  %v2080_v39 = vmul.f32 -1.442695, %v1336_v63 }
 0x304   : > { %v1421_v2 = vadd.f32 1.0, %v2227_v0 }
 0x305   : > { %2228 = vpow2.f32 %v2080_v39 }
 0x306   : > { %2230 = vrcp.f32 %v1421_v2  ;;  %v1448_v10 = vand.u32 2147483648, %v1421_v2  ;;  %v1446_v13 = vand.u32 2147483647, %v1421_v2  ;;  %vm1442_vm5 = vweird.f32 %v1421_v2 }
 0x308   : > { %v1338_v3 = vpop.f32.mrf.mxu1  ;;  %v1449_v21 = vor.u32 1.1754944e-38, %v1448_v10  ;;  %vm1447_vm7 = vcmp.eq.f32.partialorder %v1446_v13, 8.507059e+37 }
 0x309   : > { %v1339_v4 = vadd.f32 %v2810_v56, %v1338_v3 }
 0x30b   : > { %v2229_v5 = vpop.eup %2228  ;;  %v2081_v7 = vmul.f32 -1.442695, %v1339_v4 }
 0x30c   : > { %v2231_v8 = vpop.eup %2230  ;;  %v1422_v52 = vadd.f32 1.0, %v2229_v5 }
 0x30d   : > { %v1438_v47 = vmul.f32 %v2231_v8, %v1421_v2  ;;  %2232 = vpow2.f32 %v2081_v7  ;;  %vm1443_vm4 = vweird.f32 %v2231_v8 }
 0x30e   : > { %2234 = vrcp.f32 %v1422_v52  ;;  %vm1444_vm6 = vmor %vm1442_vm5, %vm1443_vm4  ;;  %v1463_v26 = vand.u32 2147483648, %v1422_v52  ;;  %v1461_v30 = vand.u32 2147483647, %v1422_v52  ;;  %vm1457_vm9 = vweird.f32 %v1422_v52 }
 0x30f   : > { %v1439_v9 = vsub.f32 1.0, %v1438_v47 }
 0x310   : > { %v1340_v11 = vpop.f32.mrf.mxu1  ;;  %v1464_v36 = vor.u32 1.1754944e-38, %v1463_v26  ;;  %vm1462_vm11 = vcmp.eq.f32.partialorder %v1461_v30, 8.507059e+37 }
 0x311   : > { %v1440_v12 = vmul.f32 %v2231_v8, %v1439_v9  ;;  %v1341_v14 = vadd.f32 %v2810_v56, %v1340_v11 }
 0x313   : > { %v2233_v17 = vpop.eup %2232  ;;  %v1441_v1 = vadd.f32 %v2231_v8, %v1440_v12  ;;  %v2082_v18 = vmul.f32 -1.442695, %v1341_v14 }
 0x314   : > { %v2235_v20 = vpop.eup %2234  ;;  %v2817_v22 = vadd.f32 1.0, %v2233_v17 }
 0x315   : > { %v1445_v23 = vsel %vm1444_vm6, %v2231_v8, %v1441_v1  ;;  %v1453_v24 = vmul.f32 %v2235_v20, %v1422_v52  ;;  %2236 = vpow2.f32 %v2082_v18  ;;  %vm1458_vm8 = vweird.f32 %v2235_v20 }
 0x316   : > { %v1450_v16 = vsel %vm1447_vm7, %v1449_v21, %v1445_v23  ;;  %2238 = vrcp.f32 %v2817_v22  ;;  %vm1459_vm10 = vmor %vm1457_vm9, %vm1458_vm8  ;;  %v1478_v44 = vand.u32 2147483648, %v2817_v22  ;;  %v1476_v48 = vand.u32 2147483647, %v2817_v22 }
 0x317   : > { %1677 = vst [vmem:[%s2822_s17] sm:$0xff] %v1450_v16  ;;  %v1454_v25 = vsub.f32 1.0, %v1453_v24  ;;  %vm1472_vm13 = vweird.f32 %v2817_v22 }
 0x318   : > { %v1343_v28 = vpop.f32.mrf.mxu1  ;;  %v1479_v45 = vor.u32 1.1754944e-38, %v1478_v44 }
 0x319   : > { %v1455_v29 = vmul.f32 %v2235_v20, %v1454_v25  ;;  %v1344_v31 = vadd.f32 %v2810_v56, %v1343_v28 }
 0x31b   : > { %v2237_v33 = vpop.eup %2236  ;;  %v1456_v34 = vadd.f32 %v2235_v20, %v1455_v29  ;;  %v2083_v32 = vmul.f32 -1.442695, %v1344_v31 }
 0x31c   : > { %v2239_v35 = vpop.eup %2238  ;;  %v2826_v37 = vadd.f32 1.0, %v2237_v33 }
 0x31d   : > { %v1460_v38 = vsel %vm1459_vm10, %v2235_v20, %v1456_v34  ;;  %v1468_v40 = vmul.f32 %v2239_v35, %v2817_v22  ;;  %2240 = vpow2.f32 %v2083_v32  ;;  %vm1473_vm12 = vweird.f32 %v2239_v35 }
 0x31e   : > { %v1465_v41 = vsel %vm1462_vm11, %v1464_v36, %v1460_v38  ;;  %2242 = vrcp.f32 %v2826_v37  ;;  %vm2842_vm14 = vmor %vm1472_vm13, %vm1473_vm12 }
 0x31f   : > { %1678 = vst [vmem:[%s2822_s17 + $0x8] sm:$0xff] %v1465_v41  ;;  %v1469_v42 = vsub.f32 1.0, %v1468_v40 }
 0x320   : > { %v1345_v6 = vpop.f32.mrf.mxu1 }
 0x321   : > { %v1470_v19 = vmul.f32 %v2239_v35, %v1469_v42  ;;  %v1346_v46 = vadd.f32 %v2810_v56, %v1345_v6 }
 0x323   : > { %v2241_v43 = vpop.eup %2240  ;;  %v1471_v15 = vadd.f32 %v2239_v35, %v1470_v19  ;;  %v2084_v49 = vmul.f32 -1.442695, %v1346_v46 }
 0x324   : > { %v2243_v50 = vpop.eup %2242  ;;  %v2846_v53 = vadd.f32 1.0, %v2241_v43 }
 0x325   : > { %2317 = shalt.err (!%p2314_p3)
}
 0x326   : > { %s2386_s0 = smov 128   ;;  %s2387_s1 = smov 8   ;;  %v1475_v54 = vsel %vm2842_vm14, %v2239_v35, %v1471_v15  ;;  %vm1477_vm15 = vcmp.eq.f32.partialorder %v1476_v48, 8.507059e+37  ;;  %v1483_v55 = vmul.f32 %v2243_v50, %v2826_v37  ;;  %2244 = vpow2.f32 %v2084_v49 }
 0x327   : > { %2176 = dma.vmem_to_hbm [thread:$0]  (%p2496_p5), %s1745_s22, 2048, %s1747_s23, %s1715_s30, %s2386_s0, %s2386_s0, %s2387_s1   ;;  %v1480_v57 = vsel %vm1477_vm15, %v1479_v45, %v1475_v54  ;;  %2246 = vrcp.f32 %v2846_v53  ;;  %v1493_v27 = vand.u32 2147483648, %v2826_v37  ;;  %vm1488_vm0 = vweird.f32 %v2243_v50 }
 0x328   : > { %1679 = vst [vmem:[%s2822_s17 + $0x10] sm:$0xff] %v1480_v57  ;;  %v1484_v58 = vsub.f32 1.0, %v1483_v55  ;;  %v1348_v59 = vpop.f32.mrf.mxu1  ;;  %v1491_v61 = vand.u32 2147483647, %v2826_v37  ;;  %vm1487_vm1 = vweird.f32 %v2826_v37  ;;  %v1508_v47 = vand.u32 2147483648, %v2846_v53  ;;  %s2965_s19 = sshll.u32 %s2479_s29, 7 }
 0x329   : > { %v1349_v62 = vadd.f32 %v2810_v56, %v1348_v59  ;;  %vm1489_vm2 = vmor %vm1487_vm1, %vm1488_vm0  ;;  %v1494_v3 = vor.u32 1.1754944e-38, %v1493_v27  ;;  %v1506_v11 = vand.u32 2147483647, %v2846_v53  ;;  %vm1502_vm5 = vweird.f32 %v2846_v53  ;;  %s1726_s30 = scalar_lea.hbm %s2946_s12, %s2965_s19  ;;  %s1727_s14 = sshll.u32 %s2822_s17, 4  ;;  %s1728_s14 = int_to_ptr.vmem [resolvable:$true] %s1727_s14 }
 0x32a   : > { %v1485_v60 = vmul.f32 %v2243_v50, %v1484_v58  ;;  %vm1492_vm3 = vcmp.eq.f32.partialorder %v1491_v61, 8.507059e+37  ;;  %v1509_v18 = vor.u32 1.1754944e-38, %v1508_v47  ;;  %s1729_s15 = sshll.u32 %s1726_s30, 4  ;;  %s1710_s29 = scalar_lea.sflag [#allocation3], %s2702_s24  ;;  %s1730_s15 = int_to_ptr.hbm [resolvable:$true] %s1729_s15 }
 0x32b   : > { %v2085_v39 = vmul.f32 -1.442695, %v1349_v62  ;;  %vm1507_vm7 = vcmp.eq.f32.partialorder %v1506_v11, 8.507059e+37  ;;  %s2332_s27 = sshra.s32 %s1730_s15, 4  ;;  %s2338_s19 = scalar_lea.hbm %s2946_s12, 256  ;;  %s2333_s27 = int_to_ptr.hbm [resolvable:$true] %s2332_s27 }
 0x32c   : > { %v2245_v63 = vpop.eup %2244  ;;  %v1486_v0 = vadd.f32 %v2243_v50, %v1485_v60  ;;  %s2334_s16 = scalar_lea.hbm %s2333_s27, 128  ;;  %p2339_p9 = scmp.lt.s32.totalorder %s2333_s27, %s2946_s12 }
 0x32d   : > { %v2247_v2 = vpop.eup %2246  ;;  %v1426_v4 = vadd.f32 1.0, %v2245_v63  ;;  %2248 = vpow2.f32 %v2085_v39  ;;  %p2335_p4 = scmp.ne.s32.totalorder %s2333_s27, %s2334_s16  ;;  %p2340_p10 = scmp.lt.s32.totalorder %s2338_s19, %s2334_s16 }
 0x32e   : > { %v1490_v5 = vsel %vm1489_vm2, %v2243_v50, %v1486_v0  ;;  %v1498_v7 = vmul.f32 %v2247_v2, %v2846_v53  ;;  %vm1503_vm4 = vweird.f32 %v2247_v2 }
 0x32f   : > { %v1495_v8 = vsel %vm1492_vm3, %v1494_v3, %v1490_v5  ;;  %2250 = vrcp.f32 %v1426_v4  ;;  %vm1504_vm6 = vmor %vm1502_vm5, %vm1503_vm4  ;;  %v1523_v16 = vand.u32 2147483648, %v1426_v4  ;;  %v1521_v28 = vand.u32 2147483647, %v1426_v4  ;;  %p2336_p7 = pnand %p2335_p4, %p2496_p5  ;;  %p2341_p11 = por %p2340_p10, %p2339_p9 }
 0x330   : > { %1680 = vst [vmem:[%s2822_s17 + $0x18] sm:$0xff] %v1495_v8  ;;  %v1499_v52 = vsub.f32 1.0, %v1498_v7  ;;  %v1350_v9 = vpop.f32.mrf.mxu1  ;;  %vm1517_vm9 = vweird.f32 %v1426_v4 }
 0x331   : > { %v1351_v12 = vadd.f32 %v2810_v56, %v1350_v9  ;;  %v1524_v32 = vor.u32 1.1754944e-38, %v1523_v16  ;;  %vm1522_vm11 = vcmp.eq.f32.partialorder %v1521_v28, 8.507059e+37  ;;  %p2337_p8 = pneg %p2336_p7 }
 0x332   : > { %v1500_v10 = vmul.f32 %v2247_v2, %v1499_v52 }
 0x333   : > { %v2249_v13 = vpop.eup %2248  ;;  %v2086_v17 = vmul.f32 -1.442695, %v1351_v12  ;;  %p2342_p12 = pnand %p2341_p11, %p2337_p8 }
 0x334   : > { %v1501_v14 = vadd.f32 %v2247_v2, %v1500_v10  ;;  %v1427_v20 = vadd.f32 1.0, %v2249_v13 }
 0x335   : > { %v2251_v1 = vpop.eup %2250  ;;  %2252 = vpow2.f32 %v2086_v17 }
 0x336   : > { %v1505_v21 = vsel %vm1504_vm6, %v2247_v2, %v1501_v14  ;;  %v1513_v22 = vmul.f32 %v2251_v1, %v1426_v4  ;;  %2254 = vrcp.f32 %v1427_v20  ;;  %vm1518_vm8 = vweird.f32 %v2251_v1 }
 0x337   : > { %v1510_v23 = vsel %vm1507_vm7, %v1509_v18, %v1505_v21  ;;  %vm1519_vm10 = vmor %vm1517_vm9, %vm1518_vm8  ;;  %v1538_v41 = vand.u32 2147483648, %v1427_v20  ;;  %v1536_v6 = vand.u32 2147483647, %v1427_v20  ;;  %vm1532_vm13 = vweird.f32 %v1427_v20 }
 0x338   : > { %1681 = vst [vmem:[%s2822_s17 + $0x20] sm:$0xff] %v1510_v23  ;;  %v1514_v24 = vsub.f32 1.0, %v1513_v22  ;;  %v1353_v25 = vpop.f32.mrf.mxu1 }
 0x339   : > { %v1354_v29 = vadd.f32 %v2810_v56, %v1353_v25  ;;  %v1539_v49 = vor.u32 1.1754944e-38, %v1538_v41  ;;  %vm1537_vm15 = vcmp.eq.f32.partialorder %v1536_v6, 8.507059e+37 }
 0x33a   : > { %v1515_v26 = vmul.f32 %v2251_v1, %v1514_v24 }
 0x33b   : > { %v2253_v30 = vpop.eup %2252  ;;  %v2087_v33 = vmul.f32 -1.442695, %v1354_v29 }
 0x33c   : > { %v1516_v31 = vadd.f32 %v2251_v1, %v1515_v26  ;;  %v2255_v34 = vpop.eup %2254  ;;  %v1428_v35 = vadd.f32 1.0, %v2253_v30 }
 0x33d   : > { %v1528_v37 = vmul.f32 %v2255_v34, %v1427_v20  ;;  %2256 = vpow2.f32 %v2087_v33  ;;  %vm1533_vm12 = vweird.f32 %v2255_v34 }
 0x33e   : > { %v1520_v36 = vsel %vm1519_vm10, %v2251_v1, %v1516_v31  ;;  %2258 = vrcp.f32 %v1428_v35  ;;  %vm1534_vm14 = vmor %vm1532_vm13, %vm1533_vm12  ;;  %v1553_v55 = vand.u32 2147483648, %v1428_v35  ;;  %v1551_v27 = vand.u32 2147483647, %v1428_v35 }
 0x33f   : > { %v1525_v38 = vsel %vm1522_vm11, %v1524_v32, %v1520_v36  ;;  %v1529_v40 = vsub.f32 1.0, %v1528_v37  ;;  %vm1547_vm1 = vweird.f32 %v1428_v35 }
 0x340   : > { %1682 = vst [vmem:[%s2822_s17 + $0x28] sm:$0xff] %v1525_v38  ;;  %v1355_v42 = vpop.f32.mrf.mxu1  ;;  %v1554_v0 = vor.u32 1.1754944e-38, %v1553_v55  ;;  %vm1552_vm3 = vcmp.eq.f32.partialorder %v1551_v27, 8.507059e+37 }
 0x341   : > { %v1530_v44 = vmul.f32 %v2255_v34, %v1529_v40  ;;  %v1356_v19 = vadd.f32 %v2810_v56, %v1355_v42 }
 0x343   : > { %v2257_v48 = vpop.eup %2256  ;;  %v1531_v46 = vadd.f32 %v2255_v34, %v1530_v44  ;;  %v2088_v43 = vmul.f32 -1.442695, %v1356_v19 }
 0x344   : > { %v2259_v15 = vpop.eup %2258  ;;  %v1429_v50 = vadd.f32 1.0, %v2257_v48 }
 0x345   : > { %v1535_v51 = vsel %vm1534_vm14, %v2255_v34, %v1531_v46  ;;  %v1543_v45 = vmul.f32 %v2259_v15, %v1428_v35  ;;  %2260 = vpow2.f32 %v2088_v43  ;;  %vm1548_vm0 = vweird.f32 %v2259_v15 }
 0x346   : > { %v1540_v53 = vsel %vm1537_vm15, %v1539_v49, %v1535_v51  ;;  %2262 = vrcp.f32 %v1429_v50  ;;  %vm1549_vm2 = vmor %vm1547_vm1, %vm1548_vm0  ;;  %v1568_v7 = vand.u32 2147483648, %v1429_v50  ;;  %v1566_v47 = vand.u32 2147483647, %v1429_v50 }
 0x347   : > { %1683 = vst [vmem:[%s2822_s17 + $0x30] sm:$0xff] %v1540_v53  ;;  %v1544_v54 = vsub.f32 1.0, %v1543_v45  ;;  %vm1562_vm5 = vweird.f32 %v1429_v50 }
 0x348   : > { %v1358_v57 = vpop.f32.mrf.mxu1  ;;  %v1569_v14 = vor.u32 1.1754944e-38, %v1568_v7  ;;  %vm1567_vm7 = vcmp.eq.f32.partialorder %v1566_v47, 8.507059e+37 }
 0x349   : > { %v1545_v58 = vmul.f32 %v2259_v15, %v1544_v54  ;;  %v1359_v59 = vadd.f32 %v2810_v56, %v1358_v57 }
 0x34b   : > { %v2261_v60 = vpop.eup %2260  ;;  %v1546_v61 = vadd.f32 %v2259_v15, %v1545_v58  ;;  %v2089_v62 = vmul.f32 -1.442695, %v1359_v59 }
 0x34c   : > { %v2263_v63 = vpop.eup %2262  ;;  %v1430_v39 = vadd.f32 1.0, %v2261_v60 }
 0x34d   : > { %v1550_v2 = vsel %vm1549_vm2, %v2259_v15, %v1546_v61  ;;  %v1558_v3 = vmul.f32 %v2263_v63, %v1429_v50  ;;  %2264 = vpow2.f32 %v2089_v62  ;;  %vm1563_vm4 = vweird.f32 %v2263_v63 }
 0x34e   : > { %v1555_v4 = vsel %vm1552_vm3, %v1554_v0, %v1550_v2  ;;  %2266 = vrcp.f32 %v1430_v39  ;;  %vm1564_vm6 = vmor %vm1562_vm5, %vm1563_vm4  ;;  %v1583_v22 = vand.u32 2147483648, %v1430_v39  ;;  %v1581_v16 = vand.u32 2147483647, %v1430_v39 }
 0x34f   : > { %1684 = vst [vmem:[%s2822_s17 + $0x38] sm:$0xff] %v1555_v4  ;;  %v1559_v5 = vsub.f32 1.0, %v1558_v3  ;;  %vm1577_vm9 = vweird.f32 %v1430_v39 }
 0x350   : > { %v1360_v8 = vpop.f32.mrf.mxu1  ;;  %v1584_v31 = vor.u32 1.1754944e-38, %v1583_v22  ;;  %vm1582_vm11 = vcmp.eq.f32.partialorder %v1581_v16, 8.507059e+37 }
 0x351   : > { %v1560_v52 = vmul.f32 %v2263_v63, %v1559_v5  ;;  %v1361_v9 = vadd.f32 %v2810_v56, %v1360_v8 }
 0x353   : > { %v2265_v10 = vpop.eup %2264  ;;  %v1561_v11 = vadd.f32 %v2263_v63, %v1560_v52  ;;  %v2090_v12 = vmul.f32 -1.442695, %v1361_v9 }
 0x354   : > { %v2267_v13 = vpop.eup %2266  ;;  %v1431_v17 = vadd.f32 1.0, %v2265_v10 }
 0x355   : > { %v1565_v1 = vsel %vm1564_vm6, %v2263_v63, %v1561_v11  ;;  %v1573_v18 = vmul.f32 %v2267_v13, %v1430_v39  ;;  %2268 = vpow2.f32 %v2090_v12  ;;  %vm1578_vm8 = vweird.f32 %v2267_v13 }
 0x356   : > { %v1570_v20 = vsel %vm1567_vm7, %v1569_v14, %v1565_v1  ;;  %2270 = vrcp.f32 %v1431_v17  ;;  %vm1579_vm10 = vmor %vm1577_vm9, %vm1578_vm8  ;;  %v1598_v37 = vand.u32 2147483648, %v1431_v17  ;;  %v1596_v41 = vand.u32 2147483647, %v1431_v17 }
 0x357   : > { %1685 = vst [vmem:[%s2822_s17 + $0x40] sm:$0xff] %v1570_v20  ;;  %v1574_v21 = vsub.f32 1.0, %v1573_v18  ;;  %vm1592_vm13 = vweird.f32 %v1431_v17 }
 0x358   : > { %v1363_v23 = vpop.f32.mrf.mxu1  ;;  %v1599_v46 = vor.u32 1.1754944e-38, %v1598_v37  ;;  %vm1597_vm15 = vcmp.eq.f32.partialorder %v1596_v41, 8.507059e+37 }
 0x359   : > { %v1575_v24 = vmul.f32 %v2267_v13, %v1574_v21  ;;  %v1364_v25 = vadd.f32 %v2810_v56, %v1363_v23 }
 0x35b   : > { %v2269_v26 = vpop.eup %2268  ;;  %v1576_v28 = vadd.f32 %v2267_v13, %v1575_v24  ;;  %v2091_v29 = vmul.f32 -1.442695, %v1364_v25 }
 0x35c   : > { %v2271_v30 = vpop.eup %2270  ;;  %v1432_v33 = vadd.f32 1.0, %v2269_v26 }
 0x35d   : > { %v1580_v34 = vsel %vm1579_vm10, %v2267_v13, %v1576_v28  ;;  %v1588_v32 = vmul.f32 %v2271_v30, %v1431_v17  ;;  %2272 = vpow2.f32 %v2091_v29  ;;  %vm1593_vm12 = vweird.f32 %v2271_v30 }
 0x35e   : > { %v1585_v35 = vsel %vm1582_vm11, %v1584_v31, %v1580_v34  ;;  %2274 = vrcp.f32 %v1432_v33  ;;  %vm1594_vm14 = vmor %vm1592_vm13, %vm1593_vm12  ;;  %v1613_v45 = vand.u32 2147483648, %v1432_v33  ;;  %v1611_v54 = vand.u32 2147483647, %v1432_v33 }
 0x35f   : > { %1686 = vst [vmem:[%s2822_s17 + $0x48] sm:$0xff] %v1585_v35  ;;  %v1589_v36 = vsub.f32 1.0, %v1588_v32  ;;  %vm1607_vm1 = vweird.f32 %v1432_v33 }
 0x360   : > { %v1365_v38 = vpop.f32.mrf.mxu1  ;;  %v1614_v27 = vor.u32 1.1754944e-38, %v1613_v45  ;;  %vm1612_vm3 = vcmp.eq.f32.partialorder %v1611_v54, 8.507059e+37 }
 0x361   : > { %v1590_v40 = vmul.f32 %v2271_v30, %v1589_v36  ;;  %v1366_v42 = vadd.f32 %v2810_v56, %v1365_v38 }
 0x363   : > { %v2273_v44 = vpop.eup %2272  ;;  %v1591_v6 = vadd.f32 %v2271_v30, %v1590_v40  ;;  %v2092_v19 = vmul.f32 -1.442695, %v1366_v42 }
 0x364   : > { %v2275_v48 = vpop.eup %2274  ;;  %v1433_v43 = vadd.f32 1.0, %v2273_v44 }
 0x365   : > { %v1595_v15 = vsel %vm1594_vm14, %v2271_v30, %v1591_v6  ;;  %v1603_v49 = vmul.f32 %v2275_v48, %v1432_v33  ;;  %2276 = vpow2.f32 %v2092_v19  ;;  %vm1608_vm0 = vweird.f32 %v2275_v48 }
 0x366   : > { %v1600_v50 = vsel %vm1597_vm15, %v1599_v46, %v1595_v15  ;;  %2278 = vrcp.f32 %v1433_v43  ;;  %vm1609_vm2 = vmor %vm1607_vm1, %vm1608_vm0  ;;  %v1628_v0 = vand.u32 2147483648, %v1433_v43  ;;  %v1626_v2 = vand.u32 2147483647, %v1433_v43 }
 0x367   : > { %1687 = vst [vmem:[%s2822_s17 + $0x50] sm:$0xff] %v1600_v50  ;;  %v1604_v51 = vsub.f32 1.0, %v1603_v49  ;;  %vm1622_vm5 = vweird.f32 %v1433_v43 }
 0x368   : > { %v1629_v5 = vor.u32 1.1754944e-38, %v1628_v0  ;;  %vm1627_vm7 = vcmp.eq.f32.partialorder %v1626_v2, 8.507059e+37 }
 0x369   : > { %v1605_v53 = vmul.f32 %v2275_v48, %v1604_v51 }
 0x36b   : > { %v2277_v55 = vpop.eup %2276  ;;  %v1606_v57 = vadd.f32 %v2275_v48, %v1605_v53 }
 0x36c   : > { %v2279_v58 = vpop.eup %2278  ;;  %v1434_v59 = vadd.f32 1.0, %v2277_v55 }
 0x36d   : > { %v1610_v60 = vsel %vm1609_vm2, %v2275_v48, %v1606_v57  ;;  %v1618_v61 = vmul.f32 %v2279_v58, %v1433_v43  ;;  %vm1623_vm4 = vweird.f32 %v2279_v58 }
 0x36e   : > { %v1615_v62 = vsel %vm1612_vm3, %v1614_v27, %v1610_v60  ;;  %2280 = vrcp.f32 %v1434_v59  ;;  %vm1624_vm6 = vmor %vm1622_vm5, %vm1623_vm4  ;;  %v1643_v9 = vand.u32 2147483648, %v1434_v59  ;;  %v1641_v12 = vand.u32 2147483647, %v1434_v59 }
 0x36f   : > { %1688 = vst [vmem:[%s2822_s17 + $0x58] sm:$0xff] %v1615_v62  ;;  %v1619_v63 = vsub.f32 1.0, %v1618_v61  ;;  %vm1637_vm9 = vweird.f32 %v1434_v59 }
 0x370   : > { %v1644_v1 = vor.u32 1.1754944e-38, %v1643_v9  ;;  %vm1642_vm11 = vcmp.eq.f32.partialorder %v1641_v12, 8.507059e+37 }
 0x371   : > { %v1620_v39 = vmul.f32 %v2279_v58, %v1619_v63 }
 0x373   : > { %v1621_v3 = vadd.f32 %v2279_v58, %v1620_v39 }
 0x374   : > { %v2281_v4 = vpop.eup %2280 }
 0x375   : > { %v1625_v7 = vsel %vm1624_vm6, %v2279_v58, %v1621_v3  ;;  %v1633_v8 = vmul.f32 %v2281_v4, %v1434_v59  ;;  %vm1638_vm8 = vweird.f32 %v2281_v4 }
 0x376   : > { %v1630_v52 = vsel %vm1627_vm7, %v1629_v5, %v1625_v7  ;;  %vm1639_vm10 = vmor %vm1637_vm9, %vm1638_vm8 }
 0x377   : > { %1689 = vst [vmem:[%s2822_s17 + $0x60] sm:$0xff] %v1630_v52  ;;  %v1634_v47 = vsub.f32 1.0, %v1633_v8 }
 0x378   : > { %v1368_v10 = vpop.f32.mrf.mxu1 }
 0x379   : > { %v1635_v11 = vmul.f32 %v2281_v4, %v1634_v47  ;;  %v1369_v13 = vadd.f32 %v2810_v56, %v1368_v10 }
 0x37b   : > { %v1636_v14 = vadd.f32 %v2281_v4, %v1635_v11  ;;  %v2093_v17 = vmul.f32 -1.442695, %v1369_v13 }
 0x37d   : > { %v1640_v18 = vsel %vm1639_vm10, %v2281_v4, %v1636_v14  ;;  %2282 = vpow2.f32 %v2093_v17 }
 0x37e   : > { %v1645_v20 = vsel %vm1642_vm11, %v1644_v1, %v1640_v18 }
 0x37f   : > { %1690 = vst [vmem:[%s2822_s17 + $0x68] sm:$0xff] %v1645_v20 }
 0x380   : > { %v1370_v21 = vpop.f32.mrf.mxu1 }
 0x381   : > { %v1371_v22 = vadd.f32 %v2810_v56, %v1370_v21 }
 0x383   : > { %v2283_v23 = vpop.eup %2282  ;;  %v2094_v24 = vmul.f32 -1.442695, %v1371_v22 }
 0x384   : > { %v1435_v16 = vadd.f32 1.0, %v2283_v23 }
 0x385   : > { %2284 = vpow2.f32 %v2094_v24 }
 0x386   : > { %2286 = vrcp.f32 %v1435_v16  ;;  %v1658_v31 = vand.u32 2147483648, %v1435_v16  ;;  %v1656_v34 = vand.u32 2147483647, %v1435_v16  ;;  %vm1652_vm13 = vweird.f32 %v1435_v16 }
 0x388   : > { %v1659_v35 = vor.u32 1.1754944e-38, %v1658_v31  ;;  %vm1657_vm15 = vcmp.eq.f32.partialorder %v1656_v34, 8.507059e+37 }
 0x38b   : > { %v2285_v25 = vpop.eup %2284 }
 0x38c   : > { %v2287_v26 = vpop.eup %2286  ;;  %v1436_v28 = vadd.f32 1.0, %v2285_v25 }
 0x38d   : > { %v1648_v29 = vmul.f32 %v2287_v26, %v1435_v16  ;;  %vm1653_vm12 = vweird.f32 %v2287_v26 }
 0x38e   : > { %2288 = vrcp.f32 %v1436_v28  ;;  %vm1654_vm14 = vmor %vm1652_vm13, %vm1653_vm12  ;;  %v1673_v41 = vand.u32 2147483648, %v1436_v28  ;;  %v1671_v44 = vand.u32 2147483647, %v1436_v28  ;;  %vm1667_vm1 = vweird.f32 %v1436_v28 }
 0x38f   : > { %v1649_v30 = vsub.f32 1.0, %v1648_v29 }
 0x390   : > { %v1674_v19 = vor.u32 1.1754944e-38, %v1673_v41  ;;  %vm1672_vm3 = vcmp.eq.f32.partialorder %v1671_v44, 8.507059e+37 }
 0x391   : > { %v1650_v33 = vmul.f32 %v2287_v26, %v1649_v30 }
 0x393   : > { %v1651_v32 = vadd.f32 %v2287_v26, %v1650_v33 }
 0x394   : > { %v2289_v56 = vpop.eup %2288 }
 0x395   : > { %v1655_v36 = vsel %vm1654_vm14, %v2287_v26, %v1651_v32  ;;  %v1663_v37 = vmul.f32 %v2289_v56, %v1436_v28  ;;  %vm1668_vm0 = vweird.f32 %v2289_v56 }
 0x396   : > { %v1660_v38 = vsel %vm1657_vm15, %v1659_v35, %v1655_v36  ;;  %vm1669_vm2 = vmor %vm1667_vm1, %vm1668_vm0 }
 0x397   : > { %1691 = vst [vmem:[%s2822_s17 + $0x70] sm:$0xff] %v1660_v38  ;;  %v1664_v40 = vsub.f32 1.0, %v1663_v37 }
 0x399   : > { %v1665_v42 = vmul.f32 %v2289_v56, %v1664_v40 }
 0x39b   : > { %v1666_v6 = vadd.f32 %v2289_v56, %v1665_v42 }
 0x39d   : > { %v1670_v48 = vsel %vm1669_vm2, %v2289_v56, %v1666_v6 }
 0x39e   : > { %v1675_v46 = vsel %vm1672_vm3, %v1674_v19, %v1670_v48 }
 0x39f   : > { %1692 = vst [vmem:[%s2822_s17 + $0x78] sm:$0xff] %v1675_v46 }
 0x3a0   : > { %2345 = shalt.err (!%p2342_p12)
}
 0x3a1   : > { %2175 = dma.vmem_to_hbm [thread:$0]  (%p2496_p5), %s1728_s14, 2048, %s1730_s15, %s1710_s29, %s2386_s0, %s2386_s0, %s2387_s1  }
 0x3a2 PF: > { %p2186_p13 = scmp.ge.s32.totalorder %s2384_s28, 2  ;;  %s1761_s17 = sand.u32 1, %s2372_s25  }
 0x3a3   : > { %s1762_s30 = scalar_lea.sflag [#allocation3], %s1761_s17 }
 0x3a4   : > { %p2180_p0 = pnand %p2186_p13, %p2500_p6 }
 0x3a6   : > { %p2181_p1 = pneg %p2180_p0 }
 0x3a8   : > { %2363 = dma.done.wait (%p2181_p1), %s1762_s30, 2048  }
 0x3a9   : > { %2365 = vsyncadd (%p2181_p1), %s1762_s30, 4294965248  ;;  %s1772_s27 = scalar_lea.sflag [#allocation5], %s1761_s17 }
 0x3aa   : > { %2367 = dma.done.wait (%p2181_p1), %s1772_s27, 2048  }
 0x3ab   : > { %2369 = vsyncadd (%p2181_p1), %s1772_s27, 4294965248  ;;  %s2967_s28 = sld [smem:[#allocation9_spill]]  ;;  %s2970_s25 = smov %s2376_s26 }
 0x3ac   : > { %s2968_s18 = sld [smem:[#allocation8_spill]] }
 0x3ad   : > { %s2969_s27 = sld [smem:[#allocation10_spill]] }
 0x3b1   : > { %p27_p5 = scmp.ge.s32.totalorder %s2967_s28, 4  }
 0x3b2   : > { %s2971_s26 = smov %s2968_s18 }
 0x3b3   :  { %29 = sbr.rel (!%p27_p5) target bundleno = 8 (0x8), region = 120 }
 0x3b8   :  { %1778 = vsyncpa [#allocation3], 1 }
 0x3b9   :  { %1780 = vsyncpa [#allocation3 + $0x1], 1 }
 0x3ba   :  { %1781 = vsyncpa [#allocation5], 1 }
 0x3bb   :  { %1783 = vsyncpa [#allocation5 + $0x1], 1 }

</bundles_post_ra>
